<compile_context>
chip_gen: v7x
topology: tpu7x:2x2x1
jax: 0.10.0
libtpu: 0.0.40
codegen_flags: <defaults>
</compile_context>

<pallas_src>
import functools

import jax
import jax.numpy as jnp
import numpy as np
from jax.experimental import pallas as pl
from jax.experimental.pallas import tpu as pltpu


# ------------------------------ fused kernel ------------------------------- #

def _odefunc_kernel(t_ref, x_ref, masks_ref, pmat_ref,
                    g1_ref, b1_ref, wx1_ref, tmap1_ref, cb1_ref,
                    g2_ref, b2_ref, wx2_ref, tmap2_ref, cb2_ref,
                    g3_ref, b3_ref,
                    o_ref, *, H, W, Cg, eps):
    HW = H * W
    t = t_ref[0]                         # scalar time (SMEM)
    pmat = pmat_ref[...]                 # (C, C) same-group indicator (0/1)
    inv_cnt = 1.0 / float(Cg * HW)

    def group_norm(h, g_ref, b_ref, relu):
        # single-pass stats: per-group sums of x and x^2, then mean / var.
        gsum = jnp.dot(pmat, h, preferred_element_type=jnp.float32)        # (C, HW)
        gsq = jnp.dot(pmat, h * h, preferred_element_type=jnp.float32)     # (C, HW)
        mean = jnp.sum(gsum, axis=1, keepdims=True) * inv_cnt              # (C, 1)
        ex2 = jnp.sum(gsq, axis=1, keepdims=True) * inv_cnt                # (C, 1)
        var = jnp.maximum(ex2 - mean * mean, 0.0)
        rstd = jax.lax.rsqrt(var + eps)                                    # (C, 1)  (EUP)
        y = (h - mean) * (rstd * g_ref[...]) + b_ref[...]
        if relu:
            y = jnp.maximum(y, 0.0)
        return y

    def conv3x3(h, wx_ref, tmap_ref, cb_ref):
        # bias + t-channel contribution folded into the fp32 accumulator init.
        acc = cb_ref[...] + t * tmap_ref[...]                              # (Cout, HW)
        for dy in range(3):
            for dx in range(3):
                k = dy * 3 + dx
                offset = (dy - 1) * W + (dx - 1)                           # flat spatial shift
                if offset == 0:
                    rolled = h
                else:
                    # rolled[p] = h[(p + offset) mod HW]; boundary wrap killed by the mask.
                    rolled = pltpu.roll(h, shift=(-offset) % HW, axis=1)
                shifted = rolled * masks_ref[k]                            # (C, HW)
                acc = acc + jnp.dot(wx_ref[k], shifted,
                                    preferred_element_type=jnp.float32)
        return acc

    h = x_ref[0].astype(jnp.float32)     # (C, HW), lane-dense
    h = group_norm(h, g1_ref, b1_ref, relu=True)
    h = conv3x3(h, wx1_ref, tmap1_ref, cb1_ref)
    h = group_norm(h, g2_ref, b2_ref, relu=True)
    h = conv3x3(h, wx2_ref, tmap2_ref, cb2_ref)
    h = group_norm(h, g3_ref, b3_ref, relu=False)
    o_ref[0] = h.astype(o_ref.dtype)


# ------------------------------ host wrapper -------------------------------- #

def _shift_masks(H, W):
    """(9, 1, H*W) validity masks for the 9 taps of a padding=1 3x3 conv."""
    HW = H * W
    masks = np.zeros((9, 1, HW), np.float32)
    for dy in range(3):
        for dx in range(3):
            k = dy * 3 + dx
            for y in range(H):
                for x in range(W):
                    if 0 <= y + dy - 1 < H and 0 <= x + dx - 1 < W:
                        masks[k, 0, y * W + x] = 1.0
    return masks


def _group_matrix(C, G):
    """(C, C) 0/1 matrix: P[i, j] = 1 iff channels i, j are in the same group."""
    Cg = C // G
    p = np.zeros((C, C), np.float32)
    for i in range(C):
        for j in range(C):
            if i // Cg == j // Cg:
                p[i, j] = 1.0
    return p


@jax.jit
def odefunc_forward(params, t, x):
    N, C, H, W = x.shape
    HW = H * W
    G = min(32, C)
    assert C % G == 0, "GroupNorm requires C % groups == 0"
    Cg = C // G
    Cout = params["w1"].shape[0]
    assert Cout == C, "ODEfunc uses dim_out == dim"

    masks = jnp.asarray(_shift_masks(H, W))              # (9, 1, HW) constant
    pmat = jnp.asarray(_group_matrix(C, G))              # (C, C)     constant

    def prep_conv(w, b):
        # w: (Cout, C+1, 3, 3) OIHW; channel 0 is the concat'ed t channel.
        wx = jnp.transpose(w[:, 1:], (2, 3, 0, 1)).reshape(9, Cout, C)     # (9, Cout, C)
        wt = w[:, 0].reshape(Cout, 9)                                      # (Cout, 9)
        tmap = jnp.dot(wt, masks.reshape(9, HW))                           # (Cout, HW)
        return wx, tmap, b.reshape(Cout, 1)

    wx1, tmap1, cb1 = prep_conv(params["w1"], params["cb1"])
    wx2, tmap2, cb2 = prep_conv(params["w2"], params["cb2"])

    t_arr = jnp.asarray(t, jnp.float32).reshape(1)

    kernel = functools.partial(_odefunc_kernel, H=H, W=W, Cg=Cg, eps=1e-5)

    def vspec(shape):
        return pl.BlockSpec(shape, lambda i, _n=len(shape): (0,) * _n)

    out = pl.pallas_call(
        kernel,
        out_shape=jax.ShapeDtypeStruct((N, Cout, HW), x.dtype),
        grid=(N,),
        in_specs=[
            pl.BlockSpec(memory_space=pltpu.MemorySpace.SMEM),             # t  (1,)
            pl.BlockSpec((1, C, HW), lambda i: (i, 0, 0)),                 # x
            vspec((9, 1, HW)),                                             # masks
            vspec((C, C)),                                                 # pmat
            vspec((C, 1)), vspec((C, 1)),                                  # g1, b1
            vspec((9, Cout, C)), vspec((Cout, HW)), vspec((Cout, 1)),      # wx1, tmap1, cb1
            vspec((C, 1)), vspec((C, 1)),                                  # g2, b2
            vspec((9, Cout, C)), vspec((Cout, HW)), vspec((Cout, 1)),      # wx2, tmap2, cb2
            vspec((C, 1)), vspec((C, 1)),                                  # g3, b3
        ],
        out_specs=pl.BlockSpec((1, Cout, HW), lambda i: (i, 0, 0)),
        compiler_params=pltpu.CompilerParams(
            dimension_semantics=("parallel",),
        ),
    )(t_arr, x.reshape(N, C, HW), masks, pmat,
      params["g1"].reshape(C, 1), params["b1"].reshape(C, 1), wx1, tmap1, cb1,
      params["g2"].reshape(C, 1), params["b2"].reshape(C, 1), wx2, tmap2, cb2,
      params["g3"].reshape(C, 1), params["b3"].reshape(C, 1))
    return out.reshape(N, Cout, H, W)


# ------------------------ pure-JAX reference (check) ------------------------ #

def _ref_groupnorm(x, gamma, beta, groups, eps=1e-5):
    N, C, H, W = x.shape
    xg = x.reshape(N, groups, -1)
    mean = xg.mean(axis=-1, keepdims=True)
    var = ((xg - mean) ** 2).mean(axis=-1, keepdims=True)
    xn = ((xg - mean) / jnp.sqrt(var + eps)).reshape(N, C, H, W)
    return xn * gamma.reshape(1, C, 1, 1) + beta.reshape(1, C, 1, 1)


def _ref_concat_conv(t, x, w, b):
    N, C, H, W = x.shape
    tt = jnp.full((N, 1, H, W), t, dtype=x.dtype)
    ttx = jnp.concatenate([tt, x], axis=1)
    y = jax.lax.conv_general_dilated(ttx, w, (1, 1), ((1, 1), (1, 1)),
                                     dimension_numbers=("NCHW", "OIHW", "NCHW"))
    return y + b.reshape(1, -1, 1, 1)


def _ref_forward(params, t, x):
    groups = min(32, x.shape[1])
    out = jnp.maximum(_ref_groupnorm(x, params["g1"], params["b1"], groups), 0.0)
    out = _ref_concat_conv(t, out, params["w1"], params["cb1"])
    out = jnp.maximum(_ref_groupnorm(out, params["g2"], params["b2"], groups), 0.0)
    out = _ref_concat_conv(t, out, params["w2"], params["cb2"])
    out = _ref_groupnorm(out, params["g3"], params["b3"], groups)
    return out


# ---------------------------------- main ------------------------------------ #

if __name__ == "__main__":
    key = jax.random.PRNGKey(0)
    N, dim, H, W = 2, 4, 16, 16
    ks = jax.random.split(key, 13)

    x = jax.random.normal(ks[0], (N, dim, H, W), jnp.float32)
    t = jnp.float32(0.5)

    params = {
        "g1": 1.0 + 0.1 * jax.random.normal(ks[1], (dim,), jnp.float32),
        "b1": 0.1 * jax.random.normal(ks[2], (dim,), jnp.float32),
        "w1": 0.1 * jax.random.normal(ks[3], (dim, dim + 1, 3, 3), jnp.float32),
        "cb1": 0.1 * jax.random.normal(ks[4], (dim,), jnp.float32),
        "g2": 1.0 + 0.1 * jax.random.normal(ks[5], (dim,), jnp.float32),
        "b2": 0.1 * jax.random.normal(ks[6], (dim,), jnp.float32),
        "w2": 0.1 * jax.random.normal(ks[7], (dim, dim + 1, 3, 3), jnp.float32),
        "cb2": 0.1 * jax.random.normal(ks[8], (dim,), jnp.float32),
        "g3": 1.0 + 0.1 * jax.random.normal(ks[9], (dim,), jnp.float32),
        "b3": 0.1 * jax.random.normal(ks[10], (dim,), jnp.float32),
    }

    out = jax.block_until_ready(odefunc_forward(params, t, x))
    ref = jax.block_until_ready(_ref_forward(params, t, x))
    np.testing.assert_allclose(np.asarray(out), np.asarray(ref), rtol=1e-3, atol=1e-3)

    print("KERNEL_OK")
</pallas_src>

<mosaic_0001>
module attributes {stable_mosaic.version = 11 : i64} {
  func.func @_odefunc_kernel(%arg0: i32, %arg1: memref<1xf32, #tpu.memory_space<smem>>, %arg2: memref<1x4x256xf32, #tpu.memory_space<vmem>>, %arg3: memref<9x1x256xf32, #tpu.memory_space<vmem>>, %arg4: memref<4x4xf32, #tpu.memory_space<vmem>>, %arg5: memref<4x1xf32, #tpu.memory_space<vmem>>, %arg6: memref<4x1xf32, #tpu.memory_space<vmem>>, %arg7: memref<9x4x4xf32, #tpu.memory_space<vmem>>, %arg8: memref<4x256xf32, #tpu.memory_space<vmem>>, %arg9: memref<4x1xf32, #tpu.memory_space<vmem>>, %arg10: memref<4x1xf32, #tpu.memory_space<vmem>>, %arg11: memref<4x1xf32, #tpu.memory_space<vmem>>, %arg12: memref<9x4x4xf32, #tpu.memory_space<vmem>>, %arg13: memref<4x256xf32, #tpu.memory_space<vmem>>, %arg14: memref<4x1xf32, #tpu.memory_space<vmem>>, %arg15: memref<4x1xf32, #tpu.memory_space<vmem>>, %arg16: memref<4x1xf32, #tpu.memory_space<vmem>>, %arg17: memref<1x4x256xf32, #tpu.memory_space<vmem>>) attributes {dimension_semantics = [#tpu.dimension_semantics<parallel>], iteration_bounds = array<i64: 2>, scalar_prefetch = 0 : i64, scratch_operands = 0 : i64, tpu.core_type = #tpu.core_type<tc>, window_params = [{transform_indices = @transform_0, window_bounds = array<i64: 1>}, {transform_indices = @transform_1, window_bounds = array<i64: 1, 4, 256>}, {pipeline_mode = #tpu.pipeline_mode<synchronous>, transform_indices = @transform_2, window_bounds = array<i64: 9, 1, 256>}, {pipeline_mode = #tpu.pipeline_mode<synchronous>, transform_indices = @transform_3, window_bounds = array<i64: 4, 4>}, {pipeline_mode = #tpu.pipeline_mode<synchronous>, transform_indices = @transform_4, window_bounds = array<i64: 4, 1>}, {pipeline_mode = #tpu.pipeline_mode<synchronous>, transform_indices = @transform_5, window_bounds = array<i64: 4, 1>}, {pipeline_mode = #tpu.pipeline_mode<synchronous>, transform_indices = @transform_6, window_bounds = array<i64: 9, 4, 4>}, {pipeline_mode = #tpu.pipeline_mode<synchronous>, transform_indices = @transform_7, window_bounds = array<i64: 4, 256>}, {pipeline_mode = #tpu.pipeline_mode<synchronous>, transform_indices = @transform_8, window_bounds = array<i64: 4, 1>}, {pipeline_mode = #tpu.pipeline_mode<synchronous>, transform_indices = @transform_9, window_bounds = array<i64: 4, 1>}, {pipeline_mode = #tpu.pipeline_mode<synchronous>, transform_indices = @transform_10, window_bounds = array<i64: 4, 1>}, {pipeline_mode = #tpu.pipeline_mode<synchronous>, transform_indices = @transform_11, window_bounds = array<i64: 9, 4, 4>}, {pipeline_mode = #tpu.pipeline_mode<synchronous>, transform_indices = @transform_12, window_bounds = array<i64: 4, 256>}, {pipeline_mode = #tpu.pipeline_mode<synchronous>, transform_indices = @transform_13, window_bounds = array<i64: 4, 1>}, {pipeline_mode = #tpu.pipeline_mode<synchronous>, transform_indices = @transform_14, window_bounds = array<i64: 4, 1>}, {pipeline_mode = #tpu.pipeline_mode<synchronous>, transform_indices = @transform_15, window_bounds = array<i64: 4, 1>}, {transform_indices = @transform_16, window_bounds = array<i64: 1, 4, 256>}]} {
    %c0 = arith.constant 0 : index
    %0 = memref.load %arg1[%c0] : memref<1xf32, #tpu.memory_space<smem>>
    %c0_0 = arith.constant 0 : index
    %c0_1 = arith.constant 0 : index
    %1 = vector.load %arg4[%c0_0, %c0_1] : memref<4x4xf32, #tpu.memory_space<vmem>>, vector<4x4xf32>
    %c0_2 = arith.constant 0 : index
    %c0_3 = arith.constant 0 : index
    %c0_4 = arith.constant 0 : index
    %2 = vector.load %arg2[%c0_2, %c0_3, %c0_4] : memref<1x4x256xf32, #tpu.memory_space<vmem>>, vector<1x4x256xf32>
    %3 = vector.shape_cast %2 : vector<1x4x256xf32> to vector<4x256xf32>
    %cst = arith.constant dense<0.000000e+00> : vector<4x256xf32>
    %4 = tpu.matmul %1, %3, %cst {dimension_numbers = #tpu.dot_dimension_numbers<[1], [0], [0], [1], [0, 0, 1, 1], [], []>} : vector<4x4xf32>, vector<4x256xf32>, vector<4x256xf32> -> vector<4x256xf32>
    %5 = arith.mulf %3, %3 : vector<4x256xf32>
    %cst_5 = arith.constant dense<0.000000e+00> : vector<4x256xf32>
    %6 = tpu.matmul %1, %5, %cst_5 {dimension_numbers = #tpu.dot_dimension_numbers<[1], [0], [0], [1], [0, 0, 1, 1], [], []>} : vector<4x4xf32>, vector<4x256xf32>, vector<4x256xf32> -> vector<4x256xf32>
    %cst_6 = arith.constant dense<0.000000e+00> : vector<4xf32>
    %7 = vector.multi_reduction <add>, %4, %cst_6 [1] : vector<4x256xf32> to vector<4xf32>
    %8 = vector.shape_cast %7 : vector<4xf32> to vector<4x1xf32>
    %cst_7 = arith.constant 3.906250e-03 : f32
    %9 = vector.broadcast %cst_7 : f32 to vector<4x1xf32>
    %10 = arith.mulf %8, %9 : vector<4x1xf32>
    %cst_8 = arith.constant dense<0.000000e+00> : vector<4xf32>
    %11 = vector.multi_reduction <add>, %6, %cst_8 [1] : vector<4x256xf32> to vector<4xf32>
    %12 = vector.shape_cast %11 : vector<4xf32> to vector<4x1xf32>
    %cst_9 = arith.constant 3.906250e-03 : f32
    %13 = vector.broadcast %cst_9 : f32 to vector<4x1xf32>
    %14 = arith.mulf %12, %13 : vector<4x1xf32>
    %15 = arith.mulf %10, %10 : vector<4x1xf32>
    %16 = arith.subf %14, %15 : vector<4x1xf32>
    %cst_10 = arith.constant 0.000000e+00 : f32
    %17 = vector.broadcast %cst_10 : f32 to vector<4x1xf32>
    %18 = arith.maximumf %16, %17 : vector<4x1xf32>
    %cst_11 = arith.constant 9.99999974E-6 : f32
    %19 = vector.broadcast %cst_11 : f32 to vector<4x1xf32>
    %20 = arith.addf %18, %19 : vector<4x1xf32>
    %21 = math.rsqrt %20 : vector<4x1xf32>
    %22 = vector.broadcast %10 : vector<4x1xf32> to vector<4x256xf32>
    %23 = arith.subf %3, %22 : vector<4x256xf32>
    %c0_12 = arith.constant 0 : index
    %c0_13 = arith.constant 0 : index
    %24 = vector.load %arg5[%c0_12, %c0_13] : memref<4x1xf32, #tpu.memory_space<vmem>>, vector<4x1xf32>
    %25 = arith.mulf %21, %24 : vector<4x1xf32>
    %26 = vector.broadcast %25 : vector<4x1xf32> to vector<4x256xf32>
    %27 = arith.mulf %23, %26 : vector<4x256xf32>
    %c0_14 = arith.constant 0 : index
    %c0_15 = arith.constant 0 : index
    %28 = vector.load %arg6[%c0_14, %c0_15] : memref<4x1xf32, #tpu.memory_space<vmem>>, vector<4x1xf32>
    %29 = vector.broadcast %28 : vector<4x1xf32> to vector<4x256xf32>
    %30 = arith.addf %27, %29 : vector<4x256xf32>
    %cst_16 = arith.constant 0.000000e+00 : f32
    %31 = vector.broadcast %cst_16 : f32 to vector<4x256xf32>
    %32 = arith.maximumf %30, %31 : vector<4x256xf32>
    %c0_17 = arith.constant 0 : index
    %c0_18 = arith.constant 0 : index
    %33 = vector.load %arg9[%c0_17, %c0_18] : memref<4x1xf32, #tpu.memory_space<vmem>>, vector<4x1xf32>
    %c0_19 = arith.constant 0 : index
    %c0_20 = arith.constant 0 : index
    %34 = vector.load %arg8[%c0_19, %c0_20] : memref<4x256xf32, #tpu.memory_space<vmem>>, vector<4x256xf32>
    %35 = vector.broadcast %0 : f32 to vector<4x256xf32>
    %36 = arith.mulf %35, %34 : vector<4x256xf32>
    %37 = vector.broadcast %33 : vector<4x1xf32> to vector<4x256xf32>
    %38 = arith.addf %37, %36 : vector<4x256xf32>
    %c17_i32 = arith.constant 17 : i32
    %39 = tpu.dynamic_rotate %32 by %c17_i32 dim 1 : vector<4x256xf32>, i32 -> vector<4x256xf32>
    %c0_21 = arith.constant 0 : index
    %c0_22 = arith.constant 0 : index
    %c0_23 = arith.constant 0 : index
    %40 = vector.load %arg3[%c0_21, %c0_22, %c0_23] : memref<9x1x256xf32, #tpu.memory_space<vmem>>, vector<1x1x256xf32>
    %41 = vector.shape_cast %40 : vector<1x1x256xf32> to vector<1x256xf32>
    %42 = vector.broadcast %41 : vector<1x256xf32> to vector<4x256xf32>
    %43 = arith.mulf %39, %42 : vector<4x256xf32>
    %c0_24 = arith.constant 0 : index
    %c0_25 = arith.constant 0 : index
    %c0_26 = arith.constant 0 : index
    %44 = vector.load %arg7[%c0_24, %c0_25, %c0_26] : memref<9x4x4xf32, #tpu.memory_space<vmem>>, vector<1x4x4xf32>
    %45 = vector.shape_cast %44 : vector<1x4x4xf32> to vector<4x4xf32>
    %cst_27 = arith.constant dense<0.000000e+00> : vector<4x256xf32>
    %46 = tpu.matmul %45, %43, %cst_27 {dimension_numbers = #tpu.dot_dimension_numbers<[1], [0], [0], [1], [0, 0, 1, 1], [], []>} : vector<4x4xf32>, vector<4x256xf32>, vector<4x256xf32> -> vector<4x256xf32>
    %47 = arith.addf %38, %46 : vector<4x256xf32>
    %c16_i32 = arith.constant 16 : i32
    %48 = tpu.dynamic_rotate %32 by %c16_i32 dim 1 : vector<4x256xf32>, i32 -> vector<4x256xf32>
    %c1 = arith.constant 1 : index
    %c0_28 = arith.constant 0 : index
    %c0_29 = arith.constant 0 : index
    %49 = vector.load %arg3[%c1, %c0_28, %c0_29] : memref<9x1x256xf32, #tpu.memory_space<vmem>>, vector<1x1x256xf32>
    %50 = vector.shape_cast %49 : vector<1x1x256xf32> to vector<1x256xf32>
    %51 = vector.broadcast %50 : vector<1x256xf32> to vector<4x256xf32>
    %52 = arith.mulf %48, %51 : vector<4x256xf32>
    %c1_30 = arith.constant 1 : index
    %c0_31 = arith.constant 0 : index
    %c0_32 = arith.constant 0 : index
    %53 = vector.load %arg7[%c1_30, %c0_31, %c0_32] : memref<9x4x4xf32, #tpu.memory_space<vmem>>, vector<1x4x4xf32>
    %54 = vector.shape_cast %53 : vector<1x4x4xf32> to vector<4x4xf32>
    %cst_33 = arith.constant dense<0.000000e+00> : vector<4x256xf32>
    %55 = tpu.matmul %54, %52, %cst_33 {dimension_numbers = #tpu.dot_dimension_numbers<[1], [0], [0], [1], [0, 0, 1, 1], [], []>} : vector<4x4xf32>, vector<4x256xf32>, vector<4x256xf32> -> vector<4x256xf32>
    %56 = arith.addf %47, %55 : vector<4x256xf32>
    %c15_i32 = arith.constant 15 : i32
    %57 = tpu.dynamic_rotate %32 by %c15_i32 dim 1 : vector<4x256xf32>, i32 -> vector<4x256xf32>
    %c2 = arith.constant 2 : index
    %c0_34 = arith.constant 0 : index
    %c0_35 = arith.constant 0 : index
    %58 = vector.load %arg3[%c2, %c0_34, %c0_35] : memref<9x1x256xf32, #tpu.memory_space<vmem>>, vector<1x1x256xf32>
    %59 = vector.shape_cast %58 : vector<1x1x256xf32> to vector<1x256xf32>
    %60 = vector.broadcast %59 : vector<1x256xf32> to vector<4x256xf32>
    %61 = arith.mulf %57, %60 : vector<4x256xf32>
    %c2_36 = arith.constant 2 : index
    %c0_37 = arith.constant 0 : index
    %c0_38 = arith.constant 0 : index
    %62 = vector.load %arg7[%c2_36, %c0_37, %c0_38] : memref<9x4x4xf32, #tpu.memory_space<vmem>>, vector<1x4x4xf32>
    %63 = vector.shape_cast %62 : vector<1x4x4xf32> to vector<4x4xf32>
    %cst_39 = arith.constant dense<0.000000e+00> : vector<4x256xf32>
    %64 = tpu.matmul %63, %61, %cst_39 {dimension_numbers = #tpu.dot_dimension_numbers<[1], [0], [0], [1], [0, 0, 1, 1], [], []>} : vector<4x4xf32>, vector<4x256xf32>, vector<4x256xf32> -> vector<4x256xf32>
    %65 = arith.addf %56, %64 : vector<4x256xf32>
    %c1_i32 = arith.constant 1 : i32
    %66 = tpu.dynamic_rotate %32 by %c1_i32 dim 1 : vector<4x256xf32>, i32 -> vector<4x256xf32>
    %c3 = arith.constant 3 : index
    %c0_40 = arith.constant 0 : index
    %c0_41 = arith.constant 0 : index
    %67 = vector.load %arg3[%c3, %c0_40, %c0_41] : memref<9x1x256xf32, #tpu.memory_space<vmem>>, vector<1x1x256xf32>
    %68 = vector.shape_cast %67 : vector<1x1x256xf32> to vector<1x256xf32>
    %69 = vector.broadcast %68 : vector<1x256xf32> to vector<4x256xf32>
    %70 = arith.mulf %66, %69 : vector<4x256xf32>
    %c3_42 = arith.constant 3 : index
    %c0_43 = arith.constant 0 : index
    %c0_44 = arith.constant 0 : index
    %71 = vector.load %arg7[%c3_42, %c0_43, %c0_44] : memref<9x4x4xf32, #tpu.memory_space<vmem>>, vector<1x4x4xf32>
    %72 = vector.shape_cast %71 : vector<1x4x4xf32> to vector<4x4xf32>
    %cst_45 = arith.constant dense<0.000000e+00> : vector<4x256xf32>
    %73 = tpu.matmul %72, %70, %cst_45 {dimension_numbers = #tpu.dot_dimension_numbers<[1], [0], [0], [1], [0, 0, 1, 1], [], []>} : vector<4x4xf32>, vector<4x256xf32>, vector<4x256xf32> -> vector<4x256xf32>
    %74 = arith.addf %65, %73 : vector<4x256xf32>
    %c4 = arith.constant 4 : index
    %c0_46 = arith.constant 0 : index
    %c0_47 = arith.constant 0 : index
    %75 = vector.load %arg3[%c4, %c0_46, %c0_47] : memref<9x1x256xf32, #tpu.memory_space<vmem>>, vector<1x1x256xf32>
    %76 = vector.shape_cast %75 : vector<1x1x256xf32> to vector<1x256xf32>
    %77 = vector.broadcast %76 : vector<1x256xf32> to vector<4x256xf32>
    %78 = arith.mulf %32, %77 : vector<4x256xf32>
    %c4_48 = arith.constant 4 : index
    %c0_49 = arith.constant 0 : index
    %c0_50 = arith.constant 0 : index
    %79 = vector.load %arg7[%c4_48, %c0_49, %c0_50] : memref<9x4x4xf32, #tpu.memory_space<vmem>>, vector<1x4x4xf32>
    %80 = vector.shape_cast %79 : vector<1x4x4xf32> to vector<4x4xf32>
    %cst_51 = arith.constant dense<0.000000e+00> : vector<4x256xf32>
    %81 = tpu.matmul %80, %78, %cst_51 {dimension_numbers = #tpu.dot_dimension_numbers<[1], [0], [0], [1], [0, 0, 1, 1], [], []>} : vector<4x4xf32>, vector<4x256xf32>, vector<4x256xf32> -> vector<4x256xf32>
    %82 = arith.addf %74, %81 : vector<4x256xf32>
    %c255_i32 = arith.constant 255 : i32
    %83 = tpu.dynamic_rotate %32 by %c255_i32 dim 1 : vector<4x256xf32>, i32 -> vector<4x256xf32>
    %c5 = arith.constant 5 : index
    %c0_52 = arith.constant 0 : index
    %c0_53 = arith.constant 0 : index
    %84 = vector.load %arg3[%c5, %c0_52, %c0_53] : memref<9x1x256xf32, #tpu.memory_space<vmem>>, vector<1x1x256xf32>
    %85 = vector.shape_cast %84 : vector<1x1x256xf32> to vector<1x256xf32>
    %86 = vector.broadcast %85 : vector<1x256xf32> to vector<4x256xf32>
    %87 = arith.mulf %83, %86 : vector<4x256xf32>
    %c5_54 = arith.constant 5 : index
    %c0_55 = arith.constant 0 : index
    %c0_56 = arith.constant 0 : index
    %88 = vector.load %arg7[%c5_54, %c0_55, %c0_56] : memref<9x4x4xf32, #tpu.memory_space<vmem>>, vector<1x4x4xf32>
    %89 = vector.shape_cast %88 : vector<1x4x4xf32> to vector<4x4xf32>
    %cst_57 = arith.constant dense<0.000000e+00> : vector<4x256xf32>
    %90 = tpu.matmul %89, %87, %cst_57 {dimension_numbers = #tpu.dot_dimension_numbers<[1], [0], [0], [1], [0, 0, 1, 1], [], []>} : vector<4x4xf32>, vector<4x256xf32>, vector<4x256xf32> -> vector<4x256xf32>
    %91 = arith.addf %82, %90 : vector<4x256xf32>
    %c241_i32 = arith.constant 241 : i32
    %92 = tpu.dynamic_rotate %32 by %c241_i32 dim 1 : vector<4x256xf32>, i32 -> vector<4x256xf32>
    %c6 = arith.constant 6 : index
    %c0_58 = arith.constant 0 : index
    %c0_59 = arith.constant 0 : index
    %93 = vector.load %arg3[%c6, %c0_58, %c0_59] : memref<9x1x256xf32, #tpu.memory_space<vmem>>, vector<1x1x256xf32>
    %94 = vector.shape_cast %93 : vector<1x1x256xf32> to vector<1x256xf32>
    %95 = vector.broadcast %94 : vector<1x256xf32> to vector<4x256xf32>
    %96 = arith.mulf %92, %95 : vector<4x256xf32>
    %c6_60 = arith.constant 6 : index
    %c0_61 = arith.constant 0 : index
    %c0_62 = arith.constant 0 : index
    %97 = vector.load %arg7[%c6_60, %c0_61, %c0_62] : memref<9x4x4xf32, #tpu.memory_space<vmem>>, vector<1x4x4xf32>
    %98 = vector.shape_cast %97 : vector<1x4x4xf32> to vector<4x4xf32>
    %cst_63 = arith.constant dense<0.000000e+00> : vector<4x256xf32>
    %99 = tpu.matmul %98, %96, %cst_63 {dimension_numbers = #tpu.dot_dimension_numbers<[1], [0], [0], [1], [0, 0, 1, 1], [], []>} : vector<4x4xf32>, vector<4x256xf32>, vector<4x256xf32> -> vector<4x256xf32>
    %100 = arith.addf %91, %99 : vector<4x256xf32>
    %c240_i32 = arith.constant 240 : i32
    %101 = tpu.dynamic_rotate %32 by %c240_i32 dim 1 : vector<4x256xf32>, i32 -> vector<4x256xf32>
    %c7 = arith.constant 7 : index
    %c0_64 = arith.constant 0 : index
    %c0_65 = arith.constant 0 : index
    %102 = vector.load %arg3[%c7, %c0_64, %c0_65] : memref<9x1x256xf32, #tpu.memory_space<vmem>>, vector<1x1x256xf32>
    %103 = vector.shape_cast %102 : vector<1x1x256xf32> to vector<1x256xf32>
    %104 = vector.broadcast %103 : vector<1x256xf32> to vector<4x256xf32>
    %105 = arith.mulf %101, %104 : vector<4x256xf32>
    %c7_66 = arith.constant 7 : index
    %c0_67 = arith.constant 0 : index
    %c0_68 = arith.constant 0 : index
    %106 = vector.load %arg7[%c7_66, %c0_67, %c0_68] : memref<9x4x4xf32, #tpu.memory_space<vmem>>, vector<1x4x4xf32>
    %107 = vector.shape_cast %106 : vector<1x4x4xf32> to vector<4x4xf32>
    %cst_69 = arith.constant dense<0.000000e+00> : vector<4x256xf32>
    %108 = tpu.matmul %107, %105, %cst_69 {dimension_numbers = #tpu.dot_dimension_numbers<[1], [0], [0], [1], [0, 0, 1, 1], [], []>} : vector<4x4xf32>, vector<4x256xf32>, vector<4x256xf32> -> vector<4x256xf32>
    %109 = arith.addf %100, %108 : vector<4x256xf32>
    %c239_i32 = arith.constant 239 : i32
    %110 = tpu.dynamic_rotate %32 by %c239_i32 dim 1 : vector<4x256xf32>, i32 -> vector<4x256xf32>
    %c8 = arith.constant 8 : index
    %c0_70 = arith.constant 0 : index
    %c0_71 = arith.constant 0 : index
    %111 = vector.load %arg3[%c8, %c0_70, %c0_71] : memref<9x1x256xf32, #tpu.memory_space<vmem>>, vector<1x1x256xf32>
    %112 = vector.shape_cast %111 : vector<1x1x256xf32> to vector<1x256xf32>
    %113 = vector.broadcast %112 : vector<1x256xf32> to vector<4x256xf32>
    %114 = arith.mulf %110, %113 : vector<4x256xf32>
    %c8_72 = arith.constant 8 : index
    %c0_73 = arith.constant 0 : index
    %c0_74 = arith.constant 0 : index
    %115 = vector.load %arg7[%c8_72, %c0_73, %c0_74] : memref<9x4x4xf32, #tpu.memory_space<vmem>>, vector<1x4x4xf32>
    %116 = vector.shape_cast %115 : vector<1x4x4xf32> to vector<4x4xf32>
    %cst_75 = arith.constant dense<0.000000e+00> : vector<4x256xf32>
    %117 = tpu.matmul %116, %114, %cst_75 {dimension_numbers = #tpu.dot_dimension_numbers<[1], [0], [0], [1], [0, 0, 1, 1], [], []>} : vector<4x4xf32>, vector<4x256xf32>, vector<4x256xf32> -> vector<4x256xf32>
    %118 = arith.addf %109, %117 : vector<4x256xf32>
    %cst_76 = arith.constant dense<0.000000e+00> : vector<4x256xf32>
    %119 = tpu.matmul %1, %118, %cst_76 {dimension_numbers = #tpu.dot_dimension_numbers<[1], [0], [0], [1], [0, 0, 1, 1], [], []>} : vector<4x4xf32>, vector<4x256xf32>, vector<4x256xf32> -> vector<4x256xf32>
    %120 = arith.mulf %118, %118 : vector<4x256xf32>
    %cst_77 = arith.constant dense<0.000000e+00> : vector<4x256xf32>
    %121 = tpu.matmul %1, %120, %cst_77 {dimension_numbers = #tpu.dot_dimension_numbers<[1], [0], [0], [1], [0, 0, 1, 1], [], []>} : vector<4x4xf32>, vector<4x256xf32>, vector<4x256xf32> -> vector<4x256xf32>
    %cst_78 = arith.constant dense<0.000000e+00> : vector<4xf32>
    %122 = vector.multi_reduction <add>, %119, %cst_78 [1] : vector<4x256xf32> to vector<4xf32>
    %123 = vector.shape_cast %122 : vector<4xf32> to vector<4x1xf32>
    %cst_79 = arith.constant 3.906250e-03 : f32
    %124 = vector.broadcast %cst_79 : f32 to vector<4x1xf32>
    %125 = arith.mulf %123, %124 : vector<4x1xf32>
    %cst_80 = arith.constant dense<0.000000e+00> : vector<4xf32>
    %126 = vector.multi_reduction <add>, %121, %cst_80 [1] : vector<4x256xf32> to vector<4xf32>
    %127 = vector.shape_cast %126 : vector<4xf32> to vector<4x1xf32>
    %cst_81 = arith.constant 3.906250e-03 : f32
    %128 = vector.broadcast %cst_81 : f32 to vector<4x1xf32>
    %129 = arith.mulf %127, %128 : vector<4x1xf32>
    %130 = arith.mulf %125, %125 : vector<4x1xf32>
    %131 = arith.subf %129, %130 : vector<4x1xf32>
    %cst_82 = arith.constant 0.000000e+00 : f32
    %132 = vector.broadcast %cst_82 : f32 to vector<4x1xf32>
    %133 = arith.maximumf %131, %132 : vector<4x1xf32>
    %cst_83 = arith.constant 9.99999974E-6 : f32
    %134 = vector.broadcast %cst_83 : f32 to vector<4x1xf32>
    %135 = arith.addf %133, %134 : vector<4x1xf32>
    %136 = math.rsqrt %135 : vector<4x1xf32>
    %137 = vector.broadcast %125 : vector<4x1xf32> to vector<4x256xf32>
    %138 = arith.subf %118, %137 : vector<4x256xf32>
    %c0_84 = arith.constant 0 : index
    %c0_85 = arith.constant 0 : index
    %139 = vector.load %arg10[%c0_84, %c0_85] : memref<4x1xf32, #tpu.memory_space<vmem>>, vector<4x1xf32>
    %140 = arith.mulf %136, %139 : vector<4x1xf32>
    %141 = vector.broadcast %140 : vector<4x1xf32> to vector<4x256xf32>
    %142 = arith.mulf %138, %141 : vector<4x256xf32>
    %c0_86 = arith.constant 0 : index
    %c0_87 = arith.constant 0 : index
    %143 = vector.load %arg11[%c0_86, %c0_87] : memref<4x1xf32, #tpu.memory_space<vmem>>, vector<4x1xf32>
    %144 = vector.broadcast %143 : vector<4x1xf32> to vector<4x256xf32>
    %145 = arith.addf %142, %144 : vector<4x256xf32>
    %cst_88 = arith.constant 0.000000e+00 : f32
    %146 = vector.broadcast %cst_88 : f32 to vector<4x256xf32>
    %147 = arith.maximumf %145, %146 : vector<4x256xf32>
    %c0_89 = arith.constant 0 : index
    %c0_90 = arith.constant 0 : index
    %148 = vector.load %arg14[%c0_89, %c0_90] : memref<4x1xf32, #tpu.memory_space<vmem>>, vector<4x1xf32>
    %c0_91 = arith.constant 0 : index
    %c0_92 = arith.constant 0 : index
    %149 = vector.load %arg13[%c0_91, %c0_92] : memref<4x256xf32, #tpu.memory_space<vmem>>, vector<4x256xf32>
    %150 = vector.broadcast %0 : f32 to vector<4x256xf32>
    %151 = arith.mulf %150, %149 : vector<4x256xf32>
    %152 = vector.broadcast %148 : vector<4x1xf32> to vector<4x256xf32>
    %153 = arith.addf %152, %151 : vector<4x256xf32>
    %c17_i32_93 = arith.constant 17 : i32
    %154 = tpu.dynamic_rotate %147 by %c17_i32_93 dim 1 : vector<4x256xf32>, i32 -> vector<4x256xf32>
    %c0_94 = arith.constant 0 : index
    %c0_95 = arith.constant 0 : index
    %c0_96 = arith.constant 0 : index
    %155 = vector.load %arg3[%c0_94, %c0_95, %c0_96] : memref<9x1x256xf32, #tpu.memory_space<vmem>>, vector<1x1x256xf32>
    %156 = vector.shape_cast %155 : vector<1x1x256xf32> to vector<1x256xf32>
    %157 = vector.broadcast %156 : vector<1x256xf32> to vector<4x256xf32>
    %158 = arith.mulf %154, %157 : vector<4x256xf32>
    %c0_97 = arith.constant 0 : index
    %c0_98 = arith.constant 0 : index
    %c0_99 = arith.constant 0 : index
    %159 = vector.load %arg12[%c0_97, %c0_98, %c0_99] : memref<9x4x4xf32, #tpu.memory_space<vmem>>, vector<1x4x4xf32>
    %160 = vector.shape_cast %159 : vector<1x4x4xf32> to vector<4x4xf32>
    %cst_100 = arith.constant dense<0.000000e+00> : vector<4x256xf32>
    %161 = tpu.matmul %160, %158, %cst_100 {dimension_numbers = #tpu.dot_dimension_numbers<[1], [0], [0], [1], [0, 0, 1, 1], [], []>} : vector<4x4xf32>, vector<4x256xf32>, vector<4x256xf32> -> vector<4x256xf32>
    %162 = arith.addf %153, %161 : vector<4x256xf32>
    %c16_i32_101 = arith.constant 16 : i32
    %163 = tpu.dynamic_rotate %147 by %c16_i32_101 dim 1 : vector<4x256xf32>, i32 -> vector<4x256xf32>
    %c1_102 = arith.constant 1 : index
    %c0_103 = arith.constant 0 : index
    %c0_104 = arith.constant 0 : index
    %164 = vector.load %arg3[%c1_102, %c0_103, %c0_104] : memref<9x1x256xf32, #tpu.memory_space<vmem>>, vector<1x1x256xf32>
    %165 = vector.shape_cast %164 : vector<1x1x256xf32> to vector<1x256xf32>
    %166 = vector.broadcast %165 : vector<1x256xf32> to vector<4x256xf32>
    %167 = arith.mulf %163, %166 : vector<4x256xf32>
    %c1_105 = arith.constant 1 : index
    %c0_106 = arith.constant 0 : index
    %c0_107 = arith.constant 0 : index
    %168 = vector.load %arg12[%c1_105, %c0_106, %c0_107] : memref<9x4x4xf32, #tpu.memory_space<vmem>>, vector<1x4x4xf32>
    %169 = vector.shape_cast %168 : vector<1x4x4xf32> to vector<4x4xf32>
    %cst_108 = arith.constant dense<0.000000e+00> : vector<4x256xf32>
    %170 = tpu.matmul %169, %167, %cst_108 {dimension_numbers = #tpu.dot_dimension_numbers<[1], [0], [0], [1], [0, 0, 1, 1], [], []>} : vector<4x4xf32>, vector<4x256xf32>, vector<4x256xf32> -> vector<4x256xf32>
    %171 = arith.addf %162, %170 : vector<4x256xf32>
    %c15_i32_109 = arith.constant 15 : i32
    %172 = tpu.dynamic_rotate %147 by %c15_i32_109 dim 1 : vector<4x256xf32>, i32 -> vector<4x256xf32>
    %c2_110 = arith.constant 2 : index
    %c0_111 = arith.constant 0 : index
    %c0_112 = arith.constant 0 : index
    %173 = vector.load %arg3[%c2_110, %c0_111, %c0_112] : memref<9x1x256xf32, #tpu.memory_space<vmem>>, vector<1x1x256xf32>
    %174 = vector.shape_cast %173 : vector<1x1x256xf32> to vector<1x256xf32>
    %175 = vector.broadcast %174 : vector<1x256xf32> to vector<4x256xf32>
    %176 = arith.mulf %172, %175 : vector<4x256xf32>
    %c2_113 = arith.constant 2 : index
    %c0_114 = arith.constant 0 : index
    %c0_115 = arith.constant 0 : index
    %177 = vector.load %arg12[%c2_113, %c0_114, %c0_115] : memref<9x4x4xf32, #tpu.memory_space<vmem>>, vector<1x4x4xf32>
    %178 = vector.shape_cast %177 : vector<1x4x4xf32> to vector<4x4xf32>
    %cst_116 = arith.constant dense<0.000000e+00> : vector<4x256xf32>
    %179 = tpu.matmul %178, %176, %cst_116 {dimension_numbers = #tpu.dot_dimension_numbers<[1], [0], [0], [1], [0, 0, 1, 1], [], []>} : vector<4x4xf32>, vector<4x256xf32>, vector<4x256xf32> -> vector<4x256xf32>
    %180 = arith.addf %171, %179 : vector<4x256xf32>
    %c1_i32_117 = arith.constant 1 : i32
    %181 = tpu.dynamic_rotate %147 by %c1_i32_117 dim 1 : vector<4x256xf32>, i32 -> vector<4x256xf32>
    %c3_118 = arith.constant 3 : index
    %c0_119 = arith.constant 0 : index
    %c0_120 = arith.constant 0 : index
    %182 = vector.load %arg3[%c3_118, %c0_119, %c0_120] : memref<9x1x256xf32, #tpu.memory_space<vmem>>, vector<1x1x256xf32>
    %183 = vector.shape_cast %182 : vector<1x1x256xf32> to vector<1x256xf32>
    %184 = vector.broadcast %183 : vector<1x256xf32> to vector<4x256xf32>
    %185 = arith.mulf %181, %184 : vector<4x256xf32>
    %c3_121 = arith.constant 3 : index
    %c0_122 = arith.constant 0 : index
    %c0_123 = arith.constant 0 : index
    %186 = vector.load %arg12[%c3_121, %c0_122, %c0_123] : memref<9x4x4xf32, #tpu.memory_space<vmem>>, vector<1x4x4xf32>
    %187 = vector.shape_cast %186 : vector<1x4x4xf32> to vector<4x4xf32>
    %cst_124 = arith.constant dense<0.000000e+00> : vector<4x256xf32>
    %188 = tpu.matmul %187, %185, %cst_124 {dimension_numbers = #tpu.dot_dimension_numbers<[1], [0], [0], [1], [0, 0, 1, 1], [], []>} : vector<4x4xf32>, vector<4x256xf32>, vector<4x256xf32> -> vector<4x256xf32>
    %189 = arith.addf %180, %188 : vector<4x256xf32>
    %c4_125 = arith.constant 4 : index
    %c0_126 = arith.constant 0 : index
    %c0_127 = arith.constant 0 : index
    %190 = vector.load %arg3[%c4_125, %c0_126, %c0_127] : memref<9x1x256xf32, #tpu.memory_space<vmem>>, vector<1x1x256xf32>
    %191 = vector.shape_cast %190 : vector<1x1x256xf32> to vector<1x256xf32>
    %192 = vector.broadcast %191 : vector<1x256xf32> to vector<4x256xf32>
    %193 = arith.mulf %147, %192 : vector<4x256xf32>
    %c4_128 = arith.constant 4 : index
    %c0_129 = arith.constant 0 : index
    %c0_130 = arith.constant 0 : index
    %194 = vector.load %arg12[%c4_128, %c0_129, %c0_130] : memref<9x4x4xf32, #tpu.memory_space<vmem>>, vector<1x4x4xf32>
    %195 = vector.shape_cast %194 : vector<1x4x4xf32> to vector<4x4xf32>
    %cst_131 = arith.constant dense<0.000000e+00> : vector<4x256xf32>
    %196 = tpu.matmul %195, %193, %cst_131 {dimension_numbers = #tpu.dot_dimension_numbers<[1], [0], [0], [1], [0, 0, 1, 1], [], []>} : vector<4x4xf32>, vector<4x256xf32>, vector<4x256xf32> -> vector<4x256xf32>
    %197 = arith.addf %189, %196 : vector<4x256xf32>
    %c255_i32_132 = arith.constant 255 : i32
    %198 = tpu.dynamic_rotate %147 by %c255_i32_132 dim 1 : vector<4x256xf32>, i32 -> vector<4x256xf32>
    %c5_133 = arith.constant 5 : index
    %c0_134 = arith.constant 0 : index
    %c0_135 = arith.constant 0 : index
    %199 = vector.load %arg3[%c5_133, %c0_134, %c0_135] : memref<9x1x256xf32, #tpu.memory_space<vmem>>, vector<1x1x256xf32>
    %200 = vector.shape_cast %199 : vector<1x1x256xf32> to vector<1x256xf32>
    %201 = vector.broadcast %200 : vector<1x256xf32> to vector<4x256xf32>
    %202 = arith.mulf %198, %201 : vector<4x256xf32>
    %c5_136 = arith.constant 5 : index
    %c0_137 = arith.constant 0 : index
    %c0_138 = arith.constant 0 : index
    %203 = vector.load %arg12[%c5_136, %c0_137, %c0_138] : memref<9x4x4xf32, #tpu.memory_space<vmem>>, vector<1x4x4xf32>
    %204 = vector.shape_cast %203 : vector<1x4x4xf32> to vector<4x4xf32>
    %cst_139 = arith.constant dense<0.000000e+00> : vector<4x256xf32>
    %205 = tpu.matmul %204, %202, %cst_139 {dimension_numbers = #tpu.dot_dimension_numbers<[1], [0], [0], [1], [0, 0, 1, 1], [], []>} : vector<4x4xf32>, vector<4x256xf32>, vector<4x256xf32> -> vector<4x256xf32>
    %206 = arith.addf %197, %205 : vector<4x256xf32>
    %c241_i32_140 = arith.constant 241 : i32
    %207 = tpu.dynamic_rotate %147 by %c241_i32_140 dim 1 : vector<4x256xf32>, i32 -> vector<4x256xf32>
    %c6_141 = arith.constant 6 : index
    %c0_142 = arith.constant 0 : index
    %c0_143 = arith.constant 0 : index
    %208 = vector.load %arg3[%c6_141, %c0_142, %c0_143] : memref<9x1x256xf32, #tpu.memory_space<vmem>>, vector<1x1x256xf32>
    %209 = vector.shape_cast %208 : vector<1x1x256xf32> to vector<1x256xf32>
    %210 = vector.broadcast %209 : vector<1x256xf32> to vector<4x256xf32>
    %211 = arith.mulf %207, %210 : vector<4x256xf32>
    %c6_144 = arith.constant 6 : index
    %c0_145 = arith.constant 0 : index
    %c0_146 = arith.constant 0 : index
    %212 = vector.load %arg12[%c6_144, %c0_145, %c0_146] : memref<9x4x4xf32, #tpu.memory_space<vmem>>, vector<1x4x4xf32>
    %213 = vector.shape_cast %212 : vector<1x4x4xf32> to vector<4x4xf32>
    %cst_147 = arith.constant dense<0.000000e+00> : vector<4x256xf32>
    %214 = tpu.matmul %213, %211, %cst_147 {dimension_numbers = #tpu.dot_dimension_numbers<[1], [0], [0], [1], [0, 0, 1, 1], [], []>} : vector<4x4xf32>, vector<4x256xf32>, vector<4x256xf32> -> vector<4x256xf32>
    %215 = arith.addf %206, %214 : vector<4x256xf32>
    %c240_i32_148 = arith.constant 240 : i32
    %216 = tpu.dynamic_rotate %147 by %c240_i32_148 dim 1 : vector<4x256xf32>, i32 -> vector<4x256xf32>
    %c7_149 = arith.constant 7 : index
    %c0_150 = arith.constant 0 : index
    %c0_151 = arith.constant 0 : index
    %217 = vector.load %arg3[%c7_149, %c0_150, %c0_151] : memref<9x1x256xf32, #tpu.memory_space<vmem>>, vector<1x1x256xf32>
    %218 = vector.shape_cast %217 : vector<1x1x256xf32> to vector<1x256xf32>
    %219 = vector.broadcast %218 : vector<1x256xf32> to vector<4x256xf32>
    %220 = arith.mulf %216, %219 : vector<4x256xf32>
    %c7_152 = arith.constant 7 : index
    %c0_153 = arith.constant 0 : index
    %c0_154 = arith.constant 0 : index
    %221 = vector.load %arg12[%c7_152, %c0_153, %c0_154] : memref<9x4x4xf32, #tpu.memory_space<vmem>>, vector<1x4x4xf32>
    %222 = vector.shape_cast %221 : vector<1x4x4xf32> to vector<4x4xf32>
    %cst_155 = arith.constant dense<0.000000e+00> : vector<4x256xf32>
    %223 = tpu.matmul %222, %220, %cst_155 {dimension_numbers = #tpu.dot_dimension_numbers<[1], [0], [0], [1], [0, 0, 1, 1], [], []>} : vector<4x4xf32>, vector<4x256xf32>, vector<4x256xf32> -> vector<4x256xf32>
    %224 = arith.addf %215, %223 : vector<4x256xf32>
    %c239_i32_156 = arith.constant 239 : i32
    %225 = tpu.dynamic_rotate %147 by %c239_i32_156 dim 1 : vector<4x256xf32>, i32 -> vector<4x256xf32>
    %c8_157 = arith.constant 8 : index
    %c0_158 = arith.constant 0 : index
    %c0_159 = arith.constant 0 : index
    %226 = vector.load %arg3[%c8_157, %c0_158, %c0_159] : memref<9x1x256xf32, #tpu.memory_space<vmem>>, vector<1x1x256xf32>
    %227 = vector.shape_cast %226 : vector<1x1x256xf32> to vector<1x256xf32>
    %228 = vector.broadcast %227 : vector<1x256xf32> to vector<4x256xf32>
    %229 = arith.mulf %225, %228 : vector<4x256xf32>
    %c8_160 = arith.constant 8 : index
    %c0_161 = arith.constant 0 : index
    %c0_162 = arith.constant 0 : index
    %230 = vector.load %arg12[%c8_160, %c0_161, %c0_162] : memref<9x4x4xf32, #tpu.memory_space<vmem>>, vector<1x4x4xf32>
    %231 = vector.shape_cast %230 : vector<1x4x4xf32> to vector<4x4xf32>
    %cst_163 = arith.constant dense<0.000000e+00> : vector<4x256xf32>
    %232 = tpu.matmul %231, %229, %cst_163 {dimension_numbers = #tpu.dot_dimension_numbers<[1], [0], [0], [1], [0, 0, 1, 1], [], []>} : vector<4x4xf32>, vector<4x256xf32>, vector<4x256xf32> -> vector<4x256xf32>
    %233 = arith.addf %224, %232 : vector<4x256xf32>
    %cst_164 = arith.constant dense<0.000000e+00> : vector<4x256xf32>
    %234 = tpu.matmul %1, %233, %cst_164 {dimension_numbers = #tpu.dot_dimension_numbers<[1], [0], [0], [1], [0, 0, 1, 1], [], []>} : vector<4x4xf32>, vector<4x256xf32>, vector<4x256xf32> -> vector<4x256xf32>
    %235 = arith.mulf %233, %233 : vector<4x256xf32>
    %cst_165 = arith.constant dense<0.000000e+00> : vector<4x256xf32>
    %236 = tpu.matmul %1, %235, %cst_165 {dimension_numbers = #tpu.dot_dimension_numbers<[1], [0], [0], [1], [0, 0, 1, 1], [], []>} : vector<4x4xf32>, vector<4x256xf32>, vector<4x256xf32> -> vector<4x256xf32>
    %cst_166 = arith.constant dense<0.000000e+00> : vector<4xf32>
    %237 = vector.multi_reduction <add>, %234, %cst_166 [1] : vector<4x256xf32> to vector<4xf32>
    %238 = vector.shape_cast %237 : vector<4xf32> to vector<4x1xf32>
    %cst_167 = arith.constant 3.906250e-03 : f32
    %239 = vector.broadcast %cst_167 : f32 to vector<4x1xf32>
    %240 = arith.mulf %238, %239 : vector<4x1xf32>
    %cst_168 = arith.constant dense<0.000000e+00> : vector<4xf32>
    %241 = vector.multi_reduction <add>, %236, %cst_168 [1] : vector<4x256xf32> to vector<4xf32>
    %242 = vector.shape_cast %241 : vector<4xf32> to vector<4x1xf32>
    %cst_169 = arith.constant 3.906250e-03 : f32
    %243 = vector.broadcast %cst_169 : f32 to vector<4x1xf32>
    %244 = arith.mulf %242, %243 : vector<4x1xf32>
    %245 = arith.mulf %240, %240 : vector<4x1xf32>
    %246 = arith.subf %244, %245 : vector<4x1xf32>
    %cst_170 = arith.constant 0.000000e+00 : f32
    %247 = vector.broadcast %cst_170 : f32 to vector<4x1xf32>
    %248 = arith.maximumf %246, %247 : vector<4x1xf32>
    %cst_171 = arith.constant 9.99999974E-6 : f32
    %249 = vector.broadcast %cst_171 : f32 to vector<4x1xf32>
    %250 = arith.addf %248, %249 : vector<4x1xf32>
    %251 = math.rsqrt %250 : vector<4x1xf32>
    %252 = vector.broadcast %240 : vector<4x1xf32> to vector<4x256xf32>
    %253 = arith.subf %233, %252 : vector<4x256xf32>
    %c0_172 = arith.constant 0 : index
    %c0_173 = arith.constant 0 : index
    %254 = vector.load %arg15[%c0_172, %c0_173] : memref<4x1xf32, #tpu.memory_space<vmem>>, vector<4x1xf32>
    %255 = arith.mulf %251, %254 : vector<4x1xf32>
    %256 = vector.broadcast %255 : vector<4x1xf32> to vector<4x256xf32>
    %257 = arith.mulf %253, %256 : vector<4x256xf32>
    %c0_174 = arith.constant 0 : index
    %c0_175 = arith.constant 0 : index
    %258 = vector.load %arg16[%c0_174, %c0_175] : memref<4x1xf32, #tpu.memory_space<vmem>>, vector<4x1xf32>
    %259 = vector.broadcast %258 : vector<4x1xf32> to vector<4x256xf32>
    %260 = arith.addf %257, %259 : vector<4x256xf32>
    %c0_176 = arith.constant 0 : index
    %c0_177 = arith.constant 0 : index
    %c0_178 = arith.constant 0 : index
    %261 = vector.load %arg17[%c0_176, %c0_177, %c0_178] : memref<1x4x256xf32, #tpu.memory_space<vmem>>, vector<1x4x256xf32>
    %262 = vector.shape_cast %261 : vector<1x4x256xf32> to vector<4x256xf32>
    %263 = vector.shape_cast %260 : vector<4x256xf32> to vector<1x4x256xf32>
    tpu.vector_store %arg17[%c0_176, %c0_177, %c0_178], %263 {strides = array<i32>} : memref<1x4x256xf32, #tpu.memory_space<vmem>>, vector<1x4x256xf32>,
    return
  }
  func.func @transform_0(%arg0: i32) -> i32 {
    %c0_i32 = arith.constant 0 : i32
    %c0_i32_0 = arith.constant 0 : i32
    return %c0_i32 : i32
  }
  func.func @transform_1(%arg0: i32) -> (i32, i32, i32) {
    %c0_i32 = arith.constant 0 : i32
    %c0_i32_0 = arith.constant 0 : i32
    %c0_i32_1 = arith.constant 0 : i32
    return %arg0, %c0_i32, %c0_i32_0 : i32, i32, i32
  }
  func.func @transform_2(%arg0: i32) -> (i32, i32, i32) {
    %c0_i32 = arith.constant 0 : i32
    %c0_i32_0 = arith.constant 0 : i32
    %c0_i32_1 = arith.constant 0 : i32
    %c0_i32_2 = arith.constant 0 : i32
    return %c0_i32, %c0_i32_0, %c0_i32_1 : i32, i32, i32
  }
  func.func @transform_3(%arg0: i32) -> (i32, i32) {
    %c0_i32 = arith.constant 0 : i32
    %c0_i32_0 = arith.constant 0 : i32
    %c0_i32_1 = arith.constant 0 : i32
    return %c0_i32, %c0_i32_0 : i32, i32
  }
  func.func @transform_4(%arg0: i32) -> (i32, i32) {
    %c0_i32 = arith.constant 0 : i32
    %c0_i32_0 = arith.constant 0 : i32
    %c0_i32_1 = arith.constant 0 : i32
    return %c0_i32, %c0_i32_0 : i32, i32
  }
  func.func @transform_5(%arg0: i32) -> (i32, i32) {
    %c0_i32 = arith.constant 0 : i32
    %c0_i32_0 = arith.constant 0 : i32
    %c0_i32_1 = arith.constant 0 : i32
    return %c0_i32, %c0_i32_0 : i32, i32
  }
  func.func @transform_6(%arg0: i32) -> (i32, i32, i32) {
    %c0_i32 = arith.constant 0 : i32
    %c0_i32_0 = arith.constant 0 : i32
    %c0_i32_1 = arith.constant 0 : i32
    %c0_i32_2 = arith.constant 0 : i32
    return %c0_i32, %c0_i32_0, %c0_i32_1 : i32, i32, i32
  }
  func.func @transform_7(%arg0: i32) -> (i32, i32) {
    %c0_i32 = arith.constant 0 : i32
    %c0_i32_0 = arith.constant 0 : i32
    %c0_i32_1 = arith.constant 0 : i32
    return %c0_i32, %c0_i32_0 : i32, i32
  }
  func.func @transform_8(%arg0: i32) -> (i32, i32) {
    %c0_i32 = arith.constant 0 : i32
    %c0_i32_0 = arith.constant 0 : i32
    %c0_i32_1 = arith.constant 0 : i32
    return %c0_i32, %c0_i32_0 : i32, i32
  }
  func.func @transform_9(%arg0: i32) -> (i32, i32) {
    %c0_i32 = arith.constant 0 : i32
    %c0_i32_0 = arith.constant 0 : i32
    %c0_i32_1 = arith.constant 0 : i32
    return %c0_i32, %c0_i32_0 : i32, i32
  }
  func.func @transform_10(%arg0: i32) -> (i32, i32) {
    %c0_i32 = arith.constant 0 : i32
    %c0_i32_0 = arith.constant 0 : i32
    %c0_i32_1 = arith.constant 0 : i32
    return %c0_i32, %c0_i32_0 : i32, i32
  }
  func.func @transform_11(%arg0: i32) -> (i32, i32, i32) {
    %c0_i32 = arith.constant 0 : i32
    %c0_i32_0 = arith.constant 0 : i32
    %c0_i32_1 = arith.constant 0 : i32
    %c0_i32_2 = arith.constant 0 : i32
    return %c0_i32, %c0_i32_0, %c0_i32_1 : i32, i32, i32
  }
  func.func @transform_12(%arg0: i32) -> (i32, i32) {
    %c0_i32 = arith.constant 0 : i32
    %c0_i32_0 = arith.constant 0 : i32
    %c0_i32_1 = arith.constant 0 : i32
    return %c0_i32, %c0_i32_0 : i32, i32
  }
  func.func @transform_13(%arg0: i32) -> (i32, i32) {
    %c0_i32 = arith.constant 0 : i32
    %c0_i32_0 = arith.constant 0 : i32
    %c0_i32_1 = arith.constant 0 : i32
    return %c0_i32, %c0_i32_0 : i32, i32
  }
  func.func @transform_14(%arg0: i32) -> (i32, i32) {
    %c0_i32 = arith.constant 0 : i32
    %c0_i32_0 = arith.constant 0 : i32
    %c0_i32_1 = arith.constant 0 : i32
    return %c0_i32, %c0_i32_0 : i32, i32
  }
  func.func @transform_15(%arg0: i32) -> (i32, i32) {
    %c0_i32 = arith.constant 0 : i32
    %c0_i32_0 = arith.constant 0 : i32
    %c0_i32_1 = arith.constant 0 : i32
    return %c0_i32, %c0_i32_0 : i32, i32
  }
  func.func @transform_16(%arg0: i32) -> (i32, i32, i32) {
    %c0_i32 = arith.constant 0 : i32
    %c0_i32_0 = arith.constant 0 : i32
    %c0_i32_1 = arith.constant 0 : i32
    return %arg0, %c0_i32, %c0_i32_0 : i32, i32, i32
  }
}

</mosaic_0001>

<bundles_post_ra>
// kernel: odefunc_forward.1
= control target key start
LH: loop header
LB: loop body
LE: loop exit
PB: predicated region body
PF: predicated region fallthrough
CT: control target
= control target key end

     0   :  { %s3268_s24 = smov 0   ;;  %s3753_s0 = inlined_call_operand.<no memory space> [shape: f32[1], index: 0, kind: input, shape index: {}]   ;;  %s3754_s1 = inlined_call_operand.vmem [shape: f32[2,4,256], index: 1, kind: input, shape index: {}]   ;;  %s3755_s2 = inlined_call_operand.vmem [shape: f32[9,1,256], index: 2, kind: input, shape index: {}]   ;;  %s3756_s3 = inlined_call_operand.vmem [shape: f32[4,4], index: 3, kind: input, shape index: {}]   ;;  %s3757_s4 = inlined_call_operand.vmem [shape: f32[4,1], index: 4, kind: input, shape index: {}]   ;;  %s3758_s5 = inlined_call_operand.vmem [shape: f32[4,1], index: 5, kind: input, shape index: {}]   ;;  %s3759_s6 = inlined_call_operand.vmem [shape: f32[9,4,4], index: 6, kind: input, shape index: {}]   ;;  %s3760_s7 = inlined_call_operand.vmem [shape: f32[4,256], index: 7, kind: input, shape index: {}]   ;;  %s3761_s8 = inlined_call_operand.vmem [shape: f32[4,1], index: 8, kind: input, shape index: {}]   ;;  %s3762_s9 = inlined_call_operand.vmem [shape: f32[4,1], index: 9, kind: input, shape index: {}]   ;;  %s3763_s10 = inlined_call_operand.vmem [shape: f32[4,1], index: 10, kind: input, shape index: {}]   ;;  %s3764_s11 = inlined_call_operand.vmem [shape: f32[9,4,4], index: 11, kind: input, shape index: {}]   ;;  %s3765_s12 = inlined_call_operand.vmem [shape: f32[4,256], index: 12, kind: input, shape index: {}]   ;;  %s3766_s13 = inlined_call_operand.vmem [shape: f32[4,1], index: 13, kind: input, shape index: {}]   ;;  %s3767_s14 = inlined_call_operand.vmem [shape: f32[4,1], index: 14, kind: input, shape index: {}]   ;;  %s3768_s15 = inlined_call_operand.vmem [shape: f32[4,1], index: 15, kind: input, shape index: {}]   ;;  %s3769_s16 = inlined_call_operand.vmem [shape: f32[2,4,256], index: 16, kind: output, shape index: {}]  }
   0x1   :  { %3773 = sst [smem:[#allocation3_spill]] %s3753_s0 }
   0x2   :  { %s3774_s23 = sld [smem:[#allocation3_spill]] }
   0x8   :  { %21 = sst [smem:[#allocation2]] %s3774_s23 }
   0x9 LB: > { %s2988_s25 = sadd.s32 4294967295, %s3167_s24   ;;  %p2992_p0 = scmp.ge.s32.totalorder %s3167_s24, 1  ;;  %s3167_s24 = sphi %s3268_s24, %s27_s24  }
   0xa   : > { %p463_p1 = scmp.lt.s32.totalorder %s3167_s24, 3 }
   0xc   : > { %p464_p2 = pnand %p2992_p0, %p463_p1 }
   0xd   : > { %p513_p3 = scmp.lt.s32.totalorder (!%p464_p2), %s2988_s25, 1  ;;  %v3169_v0 = vmov (!%p464_p2), 0.0   ;;  %vm532_vm0 = vcmask (!%p464_p2), 1043456   ;;  %v3289_v4 = vld [vmem:[%s3756_s3] sm:$0xf] (!%p464_p2)  ;;  %vm528_vm1 = vcmask (!%p464_p2), 31744   ;;  %v707_v31 = vlaneseq (!%p464_p2) }
   0xe   : > { %467 = sbr.rel (%p464_p2) target bundleno = 2393 (0x959), region = 84  ;;  %601 = vmatprep.mubr.f32.mxu0 (!%p464_p2), %v3169_v0  ;;  %679 = vmatprep.mubr.f32.mxu1 (!%p464_p2), %v3169_v0  ;;  %v3170_v16 = vmov (!%p464_p2), 0   ;;  %v713_v25 = vld [vmem:[%s3757_s4] sm:$0xf] (!%p464_p2)  ;;  %v3171_v29 = vmov (!%p464_p2), 839922192  }
   0xf   : > { %3152 = vset.pattern.permute.xlu1 (!%p464_p2), %v3170_v16  ;;  %3153 = vset.pattern.permute.xlu0 (!%p464_p2), %v3170_v16  ;;  %v728_v28 = vld [vmem:[%s3758_s5] sm:$0xf] (!%p464_p2)  ;;  %v705_v30 = vunpack.c.l.s4 (!%p464_p2), %v3171_v29  ;;  %v708_v33 = vshrl.u32 (!%p464_p2), %v707_v31, 7  ;;  %s3172_s21 = smov (!%p464_p2), 17   ;;  %s3173_s22 = smov (!%p464_p2), 1   ;;  %v3342_v46 = vand.u32 (!%p464_p2), 127, %v707_v31 }
  0x10   : > { %s3174_s23 = smov (!%p464_p2), 16   ;;  %s3175_s27 = smov (!%p464_p2), 127   ;;  %v743_v45 = vld [vmem:[%s3761_s8] sm:$0xf] (!%p464_p2)  ;;  %v3026_v31 = vld [vmem:[%s3755_s2 + $0xa] sm:$0x3] (!%p464_p2) }
  0x11   : > { %v706_v32 = vunpack.c.0.s8 (!%p464_p2), %v705_v30  ;;  %s3176_s28 = smov (!%p464_p2), 113   ;;  %s3178_s30 = smov (!%p464_p2), 112   ;;  %v769_v47 = vld [vmem:[%s3755_s2] sm:$0x3] (!%p464_p2)  ;;  %v3347_v48 = vsub.s32 (!%p464_p2), 0, %v708_v33  ;;  %v3349_v49 = vsub.s32 (!%p464_p2), 1, %v708_v33 }
  0x12   : > { %s3771_s0 = smov (!%p464_p2), 111   ;;  %vm766_vm2 = vcmp.lt.s32.totalorder (!%p464_p2), %v3342_v46, 17  ;;  %v783_v58 = vld [vmem:[%s3759_s6] sm:$0xf] (!%p464_p2)  ;;  %vm870_vm3 = vcmp.lt.s32.totalorder (!%p464_p2), %v3342_v46, 16  ;;  %vm976_vm4 = vcmp.lt.s32.totalorder (!%p464_p2), %v3342_v46, 15 }
  0x13   : > { %v709_v34 = vsub.s32 (!%p464_p2), %v706_v32, %v708_v33  ;;  %v3353_v50 = vrot.slane (!%p464_p2), %v769_v47, %v3347_v48  ;;  %v3356_v51 = vrot.slane (!%p464_p2), %v769_v47, %v3349_v49  ;;  %v3006_v59 = vld [vmem:[%s3755_s2 + $0x2] sm:$0x3] (!%p464_p2)  ;;  %vm1082_vm5 = vcmp.lt.s32.totalorder (!%p464_p2), %v3342_v46, 1  ;;  %v3022_v47 = vld [vmem:[%s3759_s6 + $0x10] sm:$0xf] (!%p464_p2)  ;;  %s3775_s17 = smov (!%p464_p2), 111  }
  0x14   : > { %v3375_v61 = vrot.slane (!%p464_p2), %v3006_v59, %v3347_v48  ;;  %v3378_v62 = vrot.slane (!%p464_p2), %v3006_v59, %v3349_v49  ;;  %vm1288_vm6 = vcmp.lt.s32.totalorder (!%p464_p2), %v3342_v46, 127  ;;  %vm1394_vm7 = vcmp.lt.s32.totalorder (!%p464_p2), %v3342_v46, 113 }
  0x15   : > { %s3778_s25 = smov (!%p513_p3, %s2988_s25), 1  ;;  %vm1500_vm8 = vcmp.lt.s32.totalorder %v3342_v46, 112  ;;  %vm1606_vm9 = vcmp.lt.s32.totalorder %v3342_v46, 111  ;;  %v1903_v46 = vld [vmem:[%s3765_s12] sm:$0xff] }
  0x16   : > { %s3770_s26 = sshll.u32 %s3778_s25, 3 }
  0x17   : > { %s517_s29 = scalar_lea.vmem %s3754_s1, %s3770_s26  ;;  %s3551_s26 = sld [smem:[#allocation2]] }
  0x18   : > { %v525_v1 = vld [vmem:[%s517_s29] sm:$0xff]  ;;  %s3177_s29 = smov 15  }
  0x19   : > { %v527_v2 = vcombine.high %v525_v1, %v525_v1  ;;  %v608_v3 = vmul.f32 %v525_v1, %v525_v1 }
  0x1b   : > { %2997 = vmatprep.subr.msk.mxu0 %vm532_vm0, %v527_v2  ;;  %v610_v5 = vcombine.high %v608_v3, %v608_v3 }
  0x1c   : > { %2998 = vmatpush1.msk.msra.mxu0 %vm532_vm0, %v525_v1 }
  0x1d   : > { %2999 = vmatmul.mubr.msk.f32.vlgmr.msra.gmra.mrb[0].mxu0 %vm528_vm1, %v3289_v4  ;;  %3000 = vmatprep.subr.msk.mxu1 %vm532_vm0, %v610_v5 }
  0x1e   : > { %3001 = vmatpush1.msk.msra.mxu1 %vm532_vm0, %v608_v3  ;;  %857 = vmatprep.mubr.f32.mxu0 %v3169_v0  ;;  %v3021_v3 = vld [vmem:[%s3755_s2 + $0x8] sm:$0x3] }
  0x1f   : > { %3002 = vmatmul.mubr.msk.f32.vlgmr.msra.gmra.mrb[0].mxu1 %vm528_vm1, %v3289_v4 }
  0x20   : > { %1778 = vmatprep.mubr.f32.mxu1 %v3169_v0 }
  0xf0   : > { %v603_v6 = vpop.f32.mrb[0].mxu0 }
  0xf1   : > { %v686_v7 = vsel %vm532_vm0, %v603_v6, 0.0  ;;  %v605_v8 = vpop.f32.mrb[1].mxu0 }
  0xf2   : > { %v687_v9 = vsel %vm532_vm0, %v605_v8, 0.0  ;;  %v681_v10 = vpop.f32.mrb[0].mxu1  ;;  %v3011_v8 = vld [vmem:[%s3755_s2 + $0x4] sm:$0x3] }
  0xf3   : > { %v692_v11 = vsel %vm532_vm0, %v681_v10, 0.0  ;;  %v683_v12 = vpop.f32.mrb[1].mxu1  ;;  %v688_v13 = vadd.f32 %v687_v9, %v686_v7  ;;  %v3007_v7 = vld [vmem:[%s3759_s6 + $0x4] sm:$0xf]  ;;  %v3398_v10 = vrot.slane %v3021_v3, %v3347_v48 }
  0xf4   : > { %v693_v14 = vsel %vm532_vm0, %v683_v12, 0.0  ;;  %v3407_v12 = vrot.slane %v3011_v8, %v3347_v48 }
  0xf5   : > { %689 = vadd.xlane.f32.xlu0 %v688_v13  ;;  %v694_v15 = vadd.f32 %v693_v14, %v692_v11  ;;  %v3401_v11 = vrot.slane %v3021_v3, %v3349_v49  ;;  %v3410_v13 = vrot.slane %v3011_v8, %v3349_v49  ;;  %v3016_v14 = vld [vmem:[%s3755_s2 + $0x6] sm:$0x3]  ;;  %v3041_v3 = vld [vmem:[%s3755_s2 + $0x10] sm:$0x3] }
  0xf7   : > { %v1197_v16 = vcombine.low %v3398_v10, %v3401_v11 }
  0xf9   : > { %695 = vadd.xlane.f32.xlu0 %v694_v15 }
 0x182   : > { %v690_v17 = vpop.xlane.xlu0 %689 }
 0x183   : > { %v691_v18 = vmul.f32 0.00390625, %v690_v17 }
 0x185   : > { %v698_v20 = vmul.f32 %v691_v18, %v691_v18  ;;  %v710_v35 = vrot.slane %v691_v18, %v709_v34 }
 0x186   : > { %v696_v19 = vpop.xlane.xlu0 %695 }
 0x187   : > { %v697_v21 = vmul.f32 0.00390625, %v696_v19  ;;  %v712_v38 = vsub.f32 %v525_v1, %v710_v35  ;;  %v3452_v35 = vrot.slane %v3026_v31, %v3349_v49 }
 0x189   : > { %v699_v22 = vsub.f32 %v697_v21, %v698_v20  ;;  %v3426_v21 = vrot.slane %v3016_v14, %v3347_v48 }
 0x18b   : > { %v700_v23 = vmax.f32 %v699_v22, 0.0  ;;  %v3429_v22 = vrot.slane %v3016_v14, %v3349_v49 }
 0x18d   : > { %v701_v24 = vadd.f32 1e-05, %v700_v23  ;;  %v3012_v23 = vld [vmem:[%s3759_s6 + $0x8] sm:$0xf] }
 0x18f   : > { %3155 = vrsqrt.f32 %v701_v24 }
 0x199   : > { %v3156_v26 = vpop.eup %3155 }
 0x19a   : > { %v714_v27 = vmul.f32 %v3156_v26, %v713_v25 }
 0x19c   : > { %717 = vperm.xlu1 %3152, %v714_v27  }
 0x1a0   : > { %731 = vperm.xlu1 %3152, %v728_v28  }
 0x21b   : > { %v718_v36 = vpop.permute.xlu1 %717 }
 0x21c   : > { %v725_v37 = vrot.slane %v718_v36, %v709_v34 }
 0x21e   : > { %v727_v40 = vmul.f32 %v725_v37, %v712_v38  ;;  %v3017_v37 = vld [vmem:[%s3759_s6 + $0xc] sm:$0xf] }
 0x21f   : > { %v732_v39 = vpop.permute.xlu1 %731 }
 0x220   : > { %v739_v41 = vrot.slane %v732_v39, %v709_v34  ;;  %v3031_v39 = vld [vmem:[%s3755_s2 + $0xc] sm:$0x3] }
 0x222   : > { %v741_v42 = vadd.f32 %v739_v41, %v727_v40  ;;  %v3470_v41 = vrot.slane %v3026_v31, %v3347_v48 }
 0x224   : > { %v3311_v43 = vmax.f32 %v741_v42, 0.0 }
 0x226   : > { %760 = vrot.lane.b32.xlu0 %v3311_v43, %s3172_s21  ;;  %v758_v44 = vcombine.high %v3311_v43, %v3311_v43  ;;  %v1199_v26 = vmul.f32 %v1197_v16, %v3311_v43 }
 0x228   : > { %762 = vrot.lane.b32.xlu1 %v758_v44, %s3172_s21  ;;  %v1203_v33 = vcombine.high %v1199_v26, %v1199_v26 }
 0x22a   : > { %1080 = vrot.lane.b32.xlu0 %v758_v44, %s3173_s22 }
 0x22c   : > { %866 = vrot.lane.b32.xlu1 %v3311_v43, %s3174_s23 }
 0x22e   : > { %1286 = vrot.lane.b32.xlu0 %v758_v44, %s3175_s27 }
 0x230   : > { %868 = vrot.lane.b32.xlu1 %v758_v44, %s3174_s23 }
 0x232   : > { %1392 = vrot.lane.b32.xlu0 %v758_v44, %s3176_s28 }
 0x234   : > { %972 = vrot.lane.b32.xlu1 %v3311_v43, %s3177_s29 }
 0x236   : > { %1498 = vrot.lane.b32.xlu0 %v758_v44, %s3178_s30 }
 0x238   : > { %974 = vrot.lane.b32.xlu1 %v758_v44, %s3177_s29 }
 0x23a   : > { %1604 = vrot.lane.b32.xlu0 %v758_v44, %s3771_s0  ;;  %v3475_v44 = vrot.slane %v3031_v39, %v3349_v49 }
 0x23c   : > { %1078 = vrot.lane.b32.xlu1 %v3311_v43, %s3173_s22 }
 0x240   : > { %1284 = vrot.lane.b32.xlu1 %v3311_v43, %s3175_s27 }
 0x244   : > { %1390 = vrot.lane.b32.xlu1 %v3311_v43, %s3176_s28 }
 0x248   : > { %1496 = vrot.lane.b32.xlu1 %v3311_v43, %s3178_s30 }
 0x24c   : > { %1602 = vrot.lane.b32.xlu1 %v3311_v43, %s3771_s0 }
 0x250   : > { %749 = vperm.xlu1 %3152, %v743_v45  }
 0x298   : > { %v761_v52 = vpop.permute.xlu0 %760 }
 0x29a   : > { %v763_v53 = vpop.permute.xlu1 %762 }
 0x29b   : > { %v767_v54 = vsel %vm766_vm2, %v761_v52, %v763_v53  ;;  %v768_v55 = vsel %vm766_vm2, %v763_v53, %v761_v52 }
 0x29c   : > { %v781_v56 = vmul.f32 %v3353_v50, %v768_v55  ;;  %v782_v57 = vmul.f32 %v3356_v51, %v767_v54  ;;  %v1081_v24 = vpop.permute.xlu0 %1080  ;;  %v3036_v54 = vld [vmem:[%s3755_s2 + $0xe] sm:$0x3] }
 0x29d   : > { %v3498_v59 = vrot.slane %v3036_v54, %v3349_v49 }
 0x29e   : > { %3003 = vmatprep.subr.msk.mxu0 %vm532_vm0, %v782_v57  ;;  %v867_v60 = vpop.permute.xlu1 %866 }
 0x29f   : > { %3004 = vmatpush1.msk.msra.mxu0 %vm532_vm0, %v781_v56  ;;  %v3493_v56 = vrot.slane %v3031_v39, %v3347_v48 }
 0x2a0   : > { %3005 = vmatmul.mubr.msk.f32.vlgmr.msra.gmra.mrb[2].mxu0 %vm528_vm1, %v783_v58  ;;  %v1287_v34 = vpop.permute.xlu0 %1286 }
 0x2a1   : > { %963 = vmatprep.mubr.f32.mxu0 %v3169_v0 }
 0x2a2   : > { %v869_v63 = vpop.permute.xlu1 %868 }
 0x2a3   : > { %v871_v1 = vsel %vm870_vm3, %v867_v60, %v869_v63  ;;  %v872_v2 = vsel %vm870_vm3, %v869_v63, %v867_v60  ;;  %v3027_v63 = vld [vmem:[%s3759_s6 + $0x14] sm:$0xf] }
 0x2a4   : > { %v886_v5 = vmul.f32 %v3375_v61, %v872_v2  ;;  %v887_v6 = vmul.f32 %v3378_v62, %v871_v1  ;;  %v1393_v42 = vpop.permute.xlu0 %1392 }
 0x2a6   : > { %3008 = vmatprep.subr.msk.mxu0 %vm532_vm0, %v887_v6  ;;  %v973_v9 = vpop.permute.xlu1 %972  ;;  %v3516_v6 = vrot.slane %v3036_v54, %v3347_v48  ;;  %v1892_v54 = vld [vmem:[%s3763_s10] sm:$0xf] }
 0x2a7   : > { %3009 = vmatpush1.msk.msra.mxu0 %vm532_vm0, %v886_v5 }
 0x2a8   : > { %3010 = vmatmul.mubr.msk.f32.vlgmr.msra.gmra.mrb[2].mxu0 %vm528_vm1, %v3007_v7  ;;  %v1499_v57 = vpop.permute.xlu0 %1498 }
 0x2a9   : > { %1069 = vmatprep.mubr.f32.mxu0 %v3169_v0 }
 0x2aa   : > { %v975_v15 = vpop.permute.xlu1 %974 }
 0x2ab   : > { %v977_v17 = vsel %vm976_vm4, %v973_v9, %v975_v15  ;;  %v978_v18 = vsel %vm976_vm4, %v975_v15, %v973_v9  ;;  %v3521_v9 = vrot.slane %v3041_v3, %v3349_v49  ;;  %v3032_v15 = vld [vmem:[%s3759_s6 + $0x18] sm:$0xf]  ;;  %v3535_v49 = vrot.slane %v3041_v3, %v3347_v48  ;;  %v3042_v48 = vld [vmem:[%s3759_s6 + $0x20] sm:$0xf] }
 0x2ac   : > { %v992_v19 = vmul.f32 %v3407_v12, %v978_v18  ;;  %v993_v20 = vmul.f32 %v3410_v13, %v977_v17  ;;  %v1605_v7 = vpop.permute.xlu0 %1604 }
 0x2ae   : > { %3013 = vmatprep.subr.msk.mxu0 %vm532_vm0, %v993_v20  ;;  %v1079_v25 = vpop.permute.xlu1 %1078 }
 0x2af   : > { %v1083_v27 = vsel %vm1082_vm5, %v1079_v25, %v1081_v24  ;;  %v1084_v28 = vsel %vm1082_vm5, %v1081_v24, %v1079_v25  ;;  %3014 = vmatpush1.msk.msra.mxu0 %vm532_vm0, %v992_v19  ;;  %v3037_v19 = vld [vmem:[%s3759_s6 + $0x1c] sm:$0xf]  ;;  %v745_v24 = vstv %s3551_s26 }
 0x2b0   : > { %v1098_v29 = vmul.f32 %v3426_v21, %v1084_v28  ;;  %v1099_v30 = vmul.f32 %v3429_v22, %v1083_v27  ;;  %3015 = vmatmul.mubr.msk.f32.vlgmr.msra.gmra.mrb[2].mxu0 %vm528_vm1, %v3012_v23  ;;  %v744_v23 = vld [vmem:[%s3760_s7] sm:$0xff] }
 0x2b1   : > { %1175 = vmatprep.mubr.f32.mxu0 %v3169_v0  ;;  %v746_v25 = vmul.f32 %v745_v24, %v744_v23 }
 0x2b2   : > { %3018 = vmatprep.subr.msk.mxu0 %vm532_vm0, %v1099_v30  ;;  %v1285_v32 = vpop.permute.xlu1 %1284 }
 0x2b3   : > { %3019 = vmatpush1.msk.msra.mxu0 %vm532_vm0, %v1098_v29  ;;  %v1290_v36 = vsel %vm1288_vm6, %v1287_v34, %v1285_v32  ;;  %v1289_v43 = vsel %vm1288_vm6, %v1285_v32, %v1287_v34 }
 0x2b4   : > { %3023 = vmatprep.subr.msk.mxu0 %vm532_vm0, %v1203_v33  ;;  %v1305_v38 = vmul.f32 %v3452_v35, %v1290_v36  ;;  %v1304_v52 = vmul.f32 %v3470_v41, %v1289_v43 }
 0x2b6   : > { %v1391_v40 = vpop.permute.xlu1 %1390 }
 0x2b7   : > { %v1396_v45 = vsel %vm1394_vm7, %v1393_v42, %v1391_v40  ;;  %v1395_v58 = vsel %vm1394_vm7, %v1391_v40, %v1393_v42 }
 0x2b8   : > { %3020 = vmatmul.mubr.msk.f32.vlgmr.msra.gmra.mrb[2].mxu0 %vm528_vm1, %v3017_v37  ;;  %v1411_v53 = vmul.f32 %v3475_v44, %v1396_v45  ;;  %v1410_v1 = vmul.f32 %v3493_v56, %v1395_v58 }
 0x2b9   : > { %3024 = vmatpush1.msk.msra.mxu0 %vm532_vm0, %v1199_v26  ;;  %1275 = vmatprep.mubr.f32.mxu0 %v3169_v0  ;;  %v753_v26 = vcombine.high %v746_v25, %v746_v25 }
 0x2ba   : > { %3028 = vmatprep.subr.msk.mxu0 %vm532_vm0, %v1305_v38  ;;  %v1497_v55 = vpop.permute.xlu1 %1496 }
 0x2bb   : > { %v1502_v60 = vsel %vm1500_vm8, %v1499_v57, %v1497_v55  ;;  %v1501_v8 = vsel %vm1500_vm8, %v1497_v55, %v1499_v57 }
 0x2bc   : > { %v1517_v2 = vmul.f32 %v3498_v59, %v1502_v60  ;;  %v1516_v16 = vmul.f32 %v3516_v6, %v1501_v8 }
 0x2be   : > { %v1603_v5 = vpop.permute.xlu1 %1602 }
 0x2bf   : > { %v1608_v14 = vsel %vm1606_vm9, %v1605_v7, %v1603_v5  ;;  %v1607_v18 = vsel %vm1606_vm9, %v1603_v5, %v1605_v7  ;;  %v1883_v5 = vld [vmem:[%s3762_s9] sm:$0xf] }
 0x2c0   : > { %3025 = vmatmul.mubr.msk.f32.vlgmr.msra.gmra.mrb[2].mxu0 %vm528_vm1, %v3022_v47  ;;  %v1623_v17 = vmul.f32 %v3521_v9, %v1608_v14  ;;  %v1622_v20 = vmul.f32 %v3535_v49, %v1607_v18 }
 0x2c1   : > { %3029 = vmatpush1.msk.msra.mxu0 %vm532_vm0, %v1304_v52  ;;  %1381 = vmatprep.mubr.f32.mxu0 %v3169_v0 }
 0x2c2   : > { %3033 = vmatprep.subr.msk.mxu0 %vm532_vm0, %v1411_v53 }
 0x2c8   : > { %3030 = vmatmul.mubr.msk.f32.vlgmr.msra.gmra.mrb[2].mxu0 %vm528_vm1, %v3027_v63 }
 0x2c9   : > { %3034 = vmatpush1.msk.msra.mxu0 %vm532_vm0, %v1410_v1  ;;  %1487 = vmatprep.mubr.f32.mxu0 %v3169_v0 }
 0x2ca   : > { %3038 = vmatprep.subr.msk.mxu0 %vm532_vm0, %v1517_v2 }
 0x2cf   : > { %v750_v27 = vpop.permute.xlu1 %749 }
 0x2d0   : > { %3035 = vmatmul.mubr.msk.f32.vlgmr.msra.gmra.mrb[2].mxu0 %vm528_vm1, %v3032_v15  ;;  %v755_v28 = vadd.f32 %v750_v27, %v746_v25  ;;  %v756_v29 = vadd.f32 %v753_v26, %v750_v27  ;;  %v1902_v26 = vld [vmem:[%s3766_s13] sm:$0xf] }
 0x2d1   : > { %3039 = vmatpush1.msk.msra.mxu0 %vm532_vm0, %v1516_v16  ;;  %1593 = vmatprep.mubr.f32.mxu0 %v3169_v0 }
 0x2d2   : > { %3043 = vmatprep.subr.msk.mxu0 %vm532_vm0, %v1623_v17 }
 0x2d8   : > { %3040 = vmatmul.mubr.msk.f32.vlgmr.msra.gmra.mrb[2].mxu0 %vm528_vm1, %v3037_v19 }
 0x2d9   : > { %3044 = vmatpush1.msk.msra.mxu0 %vm532_vm0, %v1622_v20  ;;  %1699 = vmatprep.mubr.f32.mxu0 %v3169_v0 }
 0x2e0   : > { %3045 = vmatmul.mubr.msk.f32.vlgmr.msra.gmra.mrb[2].mxu0 %vm528_vm1, %v3042_v48 }
 0x2e1   : > { %2806 = vmatprep.mubr.f32.mxu0 %v3169_v0 }
 0x3b3   : > { %v1701_v30 = vpop.f32.mrb[2].mxu0 }
 0x3b4   : > { %v3097_v31 = vadd.f32 %v1701_v30, %v755_v28  ;;  %v1703_v32 = vpop.f32.mrb[3].mxu0 }
 0x3b5   : > { %v3098_v33 = vadd.f32 %v1703_v32, %v756_v29 }
 0x3b6   : > { %v1785_v36 = vmul.f32 %v3097_v31, %v3097_v31 }
 0x3b7   : > { %v1786_v34 = vmul.f32 %v3098_v33, %v3098_v33  ;;  %3046 = vmatprep.subr.msk.mxu1 %vm532_vm0, %v3098_v33 }
 0x3b8   : > { %3047 = vmatpush1.msk.msra.mxu1 %vm532_vm0, %v3097_v31 }
 0x3b9   : > { %3048 = vmatmul.mubr.msk.f32.vlgmr.msra.gmra.mrb[2].mxu1 %vm528_vm1, %v3289_v4  ;;  %3049 = vmatprep.subr.msk.mxu1 %vm532_vm0, %v1786_v34 }
 0x3ba   : > { %3050 = vmatpush1.msk.msra.mxu1 %vm532_vm0, %v1785_v36  ;;  %1857 = vmatprep.mubr.f32.mxu1 %v3169_v0 }
 0x3bd   : > { %3051 = vmatmul.mubr.msk.f32.vlgmr.msra.gmra.mrb[4].mxu1 %vm528_vm1, %v3289_v4 }
 0x3be   : > { %1997 = vmatprep.mubr.f32.mxu1 %v3169_v0 }
 0x48c   : > { %v1780_v37 = vpop.f32.mrb[2].mxu1 }
 0x48d   : > { %v1864_v38 = vsel %vm532_vm0, %v1780_v37, 0.0  ;;  %v1782_v39 = vpop.f32.mrb[3].mxu1 }
 0x48e   : > { %v1865_v40 = vsel %vm532_vm0, %v1782_v39, 0.0 }
 0x48f   : > { %v1866_v42 = vadd.f32 %v1865_v40, %v1864_v38  ;;  %v3055_v40 = vld [vmem:[%s3764_s11 + $0x4] sm:$0xf] }
 0x490   : > { %v1859_v43 = vpop.f32.mrb[4].mxu1 }
 0x491   : > { %v1870_v45 = vsel %vm532_vm0, %v1859_v43, 0.0  ;;  %1867 = vadd.xlane.f32.xlu0 %v1866_v42  ;;  %v1861_v47 = vpop.f32.mrb[5].mxu1 }
 0x492   : > { %v1871_v52 = vsel %vm532_vm0, %v1861_v47, 0.0 }
 0x493   : > { %v1872_v53 = vadd.f32 %v1871_v52, %v1870_v45 }
 0x495   : > { %1873 = vadd.xlane.f32.xlu1 %v1872_v53 }
 0x4a6   : > { %1895 = vperm.xlu1 %3152, %v1892_v54  }
 0x51e   : > { %v1868_v55 = vpop.xlane.xlu0 %1867 }
 0x51f   : > { %v1869_v57 = vmul.f32 0.00390625, %v1868_v55 }
 0x521   : > { %v1876_v60 = vmul.f32 %v1869_v57, %v1869_v57  ;;  %v1881_v14 = vsub.f32 %v3097_v31, %v1869_v57  ;;  %v1882_v15 = vsub.f32 %v3098_v33, %v1869_v57  ;;  %v1923_v33 = vld [vmem:[%s3764_s11] sm:$0xf] }
 0x522   : > { %v1874_v58 = vpop.xlane.xlu1 %1873 }
 0x523   : > { %v1875_v63 = vmul.f32 0.00390625, %v1874_v58 }
 0x525   : > { %v1877_v1 = vsub.f32 %v1875_v63, %v1876_v60  ;;  %v3063_v63 = vld [vmem:[%s3764_s11 + $0xc] sm:$0xf] }
 0x526   : > { %v1896_v19 = vpop.permute.xlu1 %1895 }
 0x527   : > { %v1878_v2 = vmax.f32 %v1877_v1, 0.0 }
 0x529   : > { %v1879_v3 = vadd.f32 1e-05, %v1878_v2 }
 0x52b   : > { %3157 = vrsqrt.f32 %v1879_v3 }
 0x535   : > { %v3158_v7 = vpop.eup %3157 }
 0x536   : > { %v1884_v8 = vmul.f32 %v3158_v7, %v1883_v5 }
 0x538   : > { %1887 = vperm.xlu0 %3153, %v1884_v8  }
 0x5b7   : > { %v1888_v16 = vpop.permute.xlu0 %1887 }
 0x5b8   : > { %v1890_v17 = vmul.f32 %v1888_v16, %v1881_v14  ;;  %v1891_v18 = vmul.f32 %v1888_v16, %v1882_v15 }
 0x5ba   : > { %v1898_v20 = vadd.f32 %v1896_v19, %v1890_v17  ;;  %v1899_v48 = vadd.f32 %v1896_v19, %v1891_v18 }
 0x5bc   : > { %v3579_v23 = vmax.f32 %v1898_v20, 0.0  ;;  %v1901_v25 = vmax.f32 %v1899_v48, 0.0 }
 0x5be   : > { %2100 = vrot.lane.b32.xlu0 %v1901_v25, %s3177_s29  ;;  %1915 = vrot.lane.b32.xlu1 %v3579_v23, %s3172_s21  ;;  %v2283_v57 = vmul.f32 %v1901_v25, %v3401_v11 }
 0x5c2   : > { %2192 = vrot.lane.b32.xlu0 %v1901_v25, %s3173_s22  ;;  %1917 = vrot.lane.b32.xlu1 %v1901_v25, %s3172_s21 }
 0x5c6   : > { %2370 = vrot.lane.b32.xlu0 %v1901_v25, %s3175_s27  ;;  %2006 = vrot.lane.b32.xlu1 %v3579_v23, %s3174_s23 }
 0x5ca   : > { %2462 = vrot.lane.b32.xlu0 %v1901_v25, %s3176_s28  ;;  %2008 = vrot.lane.b32.xlu1 %v1901_v25, %s3174_s23  ;;  %s3776_s23 = sshll.u32 %s3778_s25, 3 }
 0x5ce   : > { %2554 = vrot.lane.b32.xlu0 %v1901_v25, %s3178_s30  ;;  %2098 = vrot.lane.b32.xlu1 %v3579_v23, %s3177_s29 }
 0x5d2   : > { %2646 = vrot.lane.b32.xlu0 %v1901_v25, %s3775_s17  ;;  %2190 = vrot.lane.b32.xlu1 %v3579_v23, %s3173_s22 }
 0x5d6   : > { %2368 = vrot.lane.b32.xlu1 %v3579_v23, %s3175_s27 }
 0x5da   : > { %2460 = vrot.lane.b32.xlu1 %v3579_v23, %s3176_s28  ;;  %s522_s28 = scalar_lea.vmem %s3769_s16, %s3776_s23 }
 0x5de   : > { %2552 = vrot.lane.b32.xlu1 %v3579_v23, %s3178_s30 }
 0x5e2   : > { %2644 = vrot.lane.b32.xlu1 %v3579_v23, %s3775_s17 }
 0x5e6   : > { %1907 = vperm.xlu1 %3152, %v1902_v26   ;;  %v3079_v26 = vld [vmem:[%s3764_s11 + $0x1c] sm:$0xf] }
 0x630   : > { %v1916_v27 = vpop.permute.xlu1 %1915 }
 0x634   : > { %v1918_v28 = vpop.permute.xlu1 %1917 }
 0x635   : > { %v1919_v29 = vsel %vm766_vm2, %v1916_v27, %v1918_v28  ;;  %v1920_v30 = vsel %vm766_vm2, %v1918_v28, %v1916_v27 }
 0x636   : > { %v1921_v31 = vmul.f32 %v1920_v30, %v3353_v50  ;;  %v1922_v32 = vmul.f32 %v1919_v29, %v3356_v51  ;;  %v2101_v51 = vpop.permute.xlu0 %2100 }
 0x638   : > { %3052 = vmatprep.subr.msk.mxu1 %vm532_vm0, %v1922_v32  ;;  %v2007_v34 = vpop.permute.xlu1 %2006 }
 0x639   : > { %3053 = vmatpush1.msk.msra.mxu1 %vm532_vm0, %v1921_v31 }
 0x63a   : > { %3054 = vmatmul.mubr.msk.f32.vlgmr.msra.gmra.mrb[6].mxu1 %vm528_vm1, %v1923_v33 }
 0x63b   : > { %2089 = vmatprep.mubr.f32.mxu1 %v3169_v0 }
 0x63c   : > { %v2009_v36 = vpop.permute.xlu1 %2008 }
 0x63d   : > { %v2010_v37 = vsel %vm870_vm3, %v2007_v34, %v2009_v36  ;;  %v2011_v50 = vsel %vm870_vm3, %v2009_v36, %v2007_v34 }
 0x63e   : > { %v2012_v38 = vmul.f32 %v2011_v50, %v3375_v61  ;;  %v2013_v39 = vmul.f32 %v2010_v37, %v3378_v62  ;;  %v2193_v62 = vpop.permute.xlu0 %2192 }
 0x640   : > { %3056 = vmatprep.subr.msk.mxu1 %vm532_vm0, %v2013_v39  ;;  %v2099_v42 = vpop.permute.xlu1 %2098 }
 0x641   : > { %v2102_v43 = vsel %vm976_vm4, %v2099_v42, %v2101_v51  ;;  %v2103_v45 = vsel %vm976_vm4, %v2101_v51, %v2099_v42  ;;  %3057 = vmatpush1.msk.msra.mxu1 %vm532_vm0, %v2012_v38 }
 0x642   : > { %v2104_v47 = vmul.f32 %v2103_v45, %v3407_v12  ;;  %v2105_v61 = vmul.f32 %v2102_v43, %v3410_v13  ;;  %3058 = vmatmul.mubr.msk.f32.vlgmr.msra.gmra.mrb[6].mxu1 %vm528_vm1, %v3055_v40  ;;  %v3059_v13 = vld [vmem:[%s3764_s11 + $0x8] sm:$0xf] }
 0x643   : > { %2181 = vmatprep.mubr.f32.mxu1 %v3169_v0 }
 0x644   : > { %3060 = vmatprep.subr.msk.mxu1 %vm532_vm0, %v2105_v61  ;;  %v2191_v52 = vpop.permute.xlu1 %2190 }
 0x645   : > { %v2194_v53 = vsel %vm1082_vm5, %v2191_v52, %v2193_v62  ;;  %3061 = vmatpush1.msk.msra.mxu1 %vm532_vm0, %v2104_v47  ;;  %v2195_v54 = vsel %vm1082_vm5, %v2193_v62, %v2191_v52 }
 0x646   : > { %v2197_v12 = vmul.f32 %v2194_v53, %v3429_v22  ;;  %v2196_v55 = vmul.f32 %v2195_v54, %v3426_v21  ;;  %v2371_v22 = vpop.permute.xlu0 %2370  ;;  %v2282_v21 = vmul.f32 %v3579_v23, %v3398_v10  ;;  %v3067_v10 = vld [vmem:[%s3764_s11 + $0x10] sm:$0xf] }
 0x648   : > { %3064 = vmatprep.subr.msk.mxu1 %vm532_vm0, %v2197_v12  ;;  %v2369_v58 = vpop.permute.xlu1 %2368 }
 0x649   : > { %v2373_v60 = vsel %vm1288_vm6, %v2371_v22, %v2369_v58  ;;  %v2372_v3 = vsel %vm1288_vm6, %v2369_v58, %v2371_v22 }
 0x64a   : > { %3062 = vmatmul.mubr.msk.f32.vlgmr.msra.gmra.mrb[6].mxu1 %vm528_vm1, %v3059_v13  ;;  %v2375_v11 = vmul.f32 %v2373_v60, %v3452_v35  ;;  %v2463_v2 = vpop.permute.xlu0 %2462  ;;  %v2374_v35 = vmul.f32 %v2372_v3, %v3470_v41  ;;  %v3071_v41 = vld [vmem:[%s3764_s11 + $0x14] sm:$0xf] }
 0x64b   : > { %3065 = vmatpush1.msk.msra.mxu1 %vm532_vm0, %v2196_v55  ;;  %2273 = vmatprep.mubr.f32.mxu1 %v3169_v0  ;;  %v2911_v55 = vld [vmem:[%s3767_s14] sm:$0xf] }
 0x64c   : > { %3068 = vmatprep.subr.msk.mxu1 %vm532_vm0, %v2283_v57  ;;  %v2461_v1 = vpop.permute.xlu1 %2460 }
 0x64d   : > { %v2465_v5 = vsel %vm1394_vm7, %v2463_v2, %v2461_v1  ;;  %v2464_v15 = vsel %vm1394_vm7, %v2461_v1, %v2463_v2 }
 0x64e   : > { %v2467_v7 = vmul.f32 %v2465_v5, %v3475_v44  ;;  %v2555_v14 = vpop.permute.xlu0 %2554  ;;  %v2466_v44 = vmul.f32 %v2464_v15, %v3493_v56  ;;  %v3075_v56 = vld [vmem:[%s3764_s11 + $0x18] sm:$0xf] }
 0x650   : > { %v2553_v8 = vpop.permute.xlu1 %2552 }
 0x651   : > { %v2557_v16 = vsel %vm1500_vm8, %v2555_v14, %v2553_v8  ;;  %v2556_v20 = vsel %vm1500_vm8, %v2553_v8, %v2555_v14 }
 0x652   : > { %3066 = vmatmul.mubr.msk.f32.vlgmr.msra.gmra.mrb[6].mxu1 %vm528_vm1, %v3063_v63  ;;  %v2559_v17 = vmul.f32 %v2557_v16, %v3498_v59  ;;  %v2647_v19 = vpop.permute.xlu0 %2646  ;;  %v2558_v59 = vmul.f32 %v2556_v20, %v3516_v6  ;;  %v3083_v6 = vld [vmem:[%s3764_s11 + $0x20] sm:$0xf] }
 0x653   : > { %3069 = vmatpush1.msk.msra.mxu1 %vm532_vm0, %v2282_v21  ;;  %2359 = vmatprep.mubr.f32.mxu1 %v3169_v0 }
 0x654   : > { %3072 = vmatprep.subr.msk.mxu1 %vm532_vm0, %v2375_v11  ;;  %v2645_v18 = vpop.permute.xlu1 %2644 }
 0x655   : > { %v2649_v48 = vsel %vm1606_vm9, %v2647_v19, %v2645_v18  ;;  %v2648_v25 = vsel %vm1606_vm9, %v2645_v18, %v2647_v19 }
 0x656   : > { %v2651_v23 = vmul.f32 %v2649_v48, %v3521_v9  ;;  %v2650_v27 = vmul.f32 %v2648_v25, %v3535_v49  ;;  %v1904_v9 = vmul.f32 %v1903_v46, %v745_v24 }
 0x658   : > { %v1911_v28 = vcombine.high %v1904_v9, %v1904_v9 }
 0x65a   : > { %3070 = vmatmul.mubr.msk.f32.vlgmr.msra.gmra.mrb[6].mxu1 %vm528_vm1, %v3067_v10 }
 0x65b   : > { %3073 = vmatpush1.msk.msra.mxu1 %vm532_vm0, %v2374_v35  ;;  %2451 = vmatprep.mubr.f32.mxu1 %v3169_v0 }
 0x65c   : > { %3076 = vmatprep.subr.msk.mxu1 %vm532_vm0, %v2467_v7 }
 0x662   : > { %3074 = vmatmul.mubr.msk.f32.vlgmr.msra.gmra.mrb[6].mxu1 %vm528_vm1, %v3071_v41 }
 0x663   : > { %3077 = vmatpush1.msk.msra.mxu1 %vm532_vm0, %v2466_v44  ;;  %2543 = vmatprep.mubr.f32.mxu1 %v3169_v0 }
 0x664   : > { %3080 = vmatprep.subr.msk.mxu1 %vm532_vm0, %v2559_v17 }
 0x665   : > { %v1908_v49 = vpop.permute.xlu1 %1907 }
 0x666   : > { %v1913_v29 = vadd.f32 %v1908_v49, %v1904_v9  ;;  %v1914_v30 = vadd.f32 %v1911_v28, %v1908_v49 }
 0x66a   : > { %3078 = vmatmul.mubr.msk.f32.vlgmr.msra.gmra.mrb[6].mxu1 %vm528_vm1, %v3075_v56 }
 0x66b   : > { %3081 = vmatpush1.msk.msra.mxu1 %vm532_vm0, %v2558_v59  ;;  %2635 = vmatprep.mubr.f32.mxu1 %v3169_v0 }
 0x66c   : > { %3084 = vmatprep.subr.msk.mxu1 %vm532_vm0, %v2651_v23 }
 0x672   : > { %3082 = vmatmul.mubr.msk.f32.vlgmr.msra.gmra.mrb[6].mxu1 %vm528_vm1, %v3079_v26 }
 0x673   : > { %3085 = vmatpush1.msk.msra.mxu1 %vm532_vm0, %v2650_v27  ;;  %2727 = vmatprep.mubr.f32.mxu1 %v3169_v0 }
 0x67a   : > { %3086 = vmatmul.mubr.msk.f32.vlgmr.msra.gmra.mrb[6].mxu1 %vm528_vm1, %v3083_v6 }
 0x74d   : > { %v2729_v31 = vpop.f32.mrb[6].mxu1 }
 0x74e   : > { %v3099_v32 = vadd.f32 %v2729_v31, %v1913_v29  ;;  %v2731_v33 = vpop.f32.mrb[7].mxu1 }
 0x74f   : > { %v3100_v34 = vadd.f32 %v2731_v33, %v1914_v30 }
 0x750   : > { %v2813_v37 = vmul.f32 %v3099_v32, %v3099_v32 }
 0x751   : > { %v2814_v36 = vmul.f32 %v3100_v34, %v3100_v34  ;;  %3087 = vmatprep.subr.msk.mxu0 %vm532_vm0, %v3100_v34 }
 0x752   : > { %3088 = vmatpush1.msk.msra.mxu0 %vm532_vm0, %v3099_v32 }
 0x753   : > { %3089 = vmatmul.mubr.msk.f32.vlgmr.msra.gmra.mrb[4].mxu0 %vm528_vm1, %v3289_v4  ;;  %3090 = vmatprep.subr.msk.mxu0 %vm532_vm0, %v2814_v36 }
 0x754   : > { %3091 = vmatpush1.msk.msra.mxu0 %vm532_vm0, %v2813_v37  ;;  %2885 = vmatprep.mubr.f32.mxu0 %v3169_v0  ;;  %v2920_v0 = vld [vmem:[%s3768_s15] sm:$0xf] }
 0x757   : > { %3092 = vmatmul.mubr.msk.f32.vlgmr.msra.gmra.mrb[6].mxu0 %vm528_vm1, %v3289_v4 }
 0x826   : > { %v2808_v24 = vpop.f32.mrb[4].mxu0 }
 0x827   : > { %v2892_v50 = vsel %vm532_vm0, %v2808_v24, 0.0  ;;  %v2810_v51 = vpop.f32.mrb[5].mxu0 }
 0x828   : > { %v2893_v38 = vsel %vm532_vm0, %v2810_v51, 0.0 }
 0x829   : > { %v2894_v39 = vadd.f32 %v2893_v38, %v2892_v50 }
 0x82a   : > { %v2887_v40 = vpop.f32.mrb[6].mxu0 }
 0x82b   : > { %v2898_v42 = vsel %vm532_vm0, %v2887_v40, 0.0  ;;  %2895 = vadd.xlane.f32.xlu0 %v2894_v39  ;;  %v2889_v43 = vpop.f32.mrb[7].mxu0 }
 0x82c   : > { %v2899_v45 = vsel %vm532_vm0, %v2889_v43, 0.0 }
 0x82d   : > { %v2900_v47 = vadd.f32 %v2899_v45, %v2898_v42 }
 0x82f   : > { %2901 = vadd.xlane.f32.xlu1 %v2900_v47 }
 0x840   : > { %2923 = vperm.xlu1 %3152, %v2920_v0  }
 0x8b8   : > { %v2896_v4 = vpop.xlane.xlu0 %2895 }
 0x8b9   : > { %v2897_v61 = vmul.f32 0.00390625, %v2896_v4 }
 0x8bb   : > { %v2904_v52 = vmul.f32 %v2897_v61, %v2897_v61  ;;  %v2909_v22 = vsub.f32 %v3099_v32, %v2897_v61  ;;  %v2910_v60 = vsub.f32 %v3100_v34, %v2897_v61 }
 0x8bc   : > { %v2902_v62 = vpop.xlane.xlu1 %2901 }
 0x8bd   : > { %v2903_v53 = vmul.f32 0.00390625, %v2902_v62 }
 0x8bf   : > { %v2905_v54 = vsub.f32 %v2903_v53, %v2904_v52 }
 0x8c0   : > { %v2924_v1 = vpop.permute.xlu1 %2923 }
 0x8c1   : > { %v2906_v12 = vmax.f32 %v2905_v54, 0.0 }
 0x8c3   : > { %v2907_v13 = vadd.f32 1e-05, %v2906_v12 }
 0x8c5   : > { %3159 = vrsqrt.f32 %v2907_v13 }
 0x8cf   : > { %v3160_v57 = vpop.eup %3159 }
 0x8d0   : > { %v2912_v58 = vmul.f32 %v3160_v57, %v2911_v55 }
 0x8d2   : > { %2915 = vperm.xlu0 %3153, %v2912_v58  }
 0x951   : > { %v2916_v63 = vpop.permute.xlu0 %2915 }
 0x952   : > { %v2918_v21 = vmul.f32 %v2916_v63, %v2909_v22  ;;  %v2919_v11 = vmul.f32 %v2916_v63, %v2910_v60 }
 0x954   : > { %v2926_v2 = vadd.f32 %v2924_v1, %v2918_v21  ;;  %v2927_v3 = vadd.f32 %v2924_v1, %v2919_v11 }
 0x956   : > { %v2930_v5 = vcombine.low %v2926_v2, %v2927_v3 }
 0x958   : > { %2932 = vst [vmem:[%s522_s28] sm:$0xff] %v2930_v5 }
 0x959 PF: > { %s27_s24 = sadd.s32 1, %s3167_s24  }
 0x95a   : > { %p24_p4 = scmp.ge.s32.totalorder %s27_s24, 4  }
 0x95c   :  { %26 = sbr.rel (!%p24_p4) target bundleno = 9 (0x9), region = 138 }

</bundles_post_ra>
